<compile_context>
chip_gen: v7x
topology: tpu7x:2x2x1
jax: 0.10.0
libtpu: 0.0.40
codegen_flags: <defaults>
</compile_context>

<pallas_src>
import functools
import warnings

import jax
import jax.numpy as jnp
import numpy as np
from jax import lax
from jax.experimental import pallas as pl
from jax.experimental.pallas import tpu as pltpu


# Does this JAX build accept pipeline_mode=pl.Buffered(n) on BlockSpec?
# Checked at *construct* time so that genuine lowering problems still fail loudly.
_WEIGHT_PIPELINE_MODE = None
if hasattr(pl, "Buffered"):
    try:
        pl.BlockSpec((8, 128), lambda i: (0, 0), pipeline_mode=pl.Buffered(1))
        _WEIGHT_PIPELINE_MODE = pl.Buffered(1)
    except TypeError:
        _WEIGHT_PIPELINE_MODE = None


# ----------------------------- Pallas kernel ------------------------------

def _layernorm(v, g, b, eps=1e-5):
    m = jnp.mean(v, axis=-1, keepdims=True)
    c = v - m
    var = jnp.mean(c * c, axis=-1, keepdims=True)
    return c * lax.rsqrt(var + eps) * g + b


def block_kernel(x_ref, ln1g, ln1b, wqkv, bqkv, wo, bo,
                 ln2g, ln2b, wfc, bfc, wpr, bpr,
                 o_ref, pv_ref, *, num_heads, compute_dtype):
    """One ResidualAttentionBlock for a single batch element (L, E)."""
    L, E = x_ref.shape
    hd = E // num_heads

    x = x_ref[...].astype(jnp.float32)                       # (L, E) f32 residual

    # --- attention branch: x + out_proj(MHA(LN1(x))) ---
    h = _layernorm(x, ln1g[...], ln1b[...])
    qkv = jnp.dot(h.astype(compute_dtype), wqkv[...],
                  preferred_element_type=jnp.float32) + bqkv[...]      # (L, 3E) f32
    q = qkv[:, :E].astype(compute_dtype)          # 1/sqrt(hd) already folded in
    k = qkv[:, E:2 * E].astype(compute_dtype)
    v = qkv[:, 2 * E:].astype(compute_dtype)

    # Static per-head loop: the full-width matmuls live outside it; each iteration
    # only holds small (L,hd)/(L,L) temporaries that die at the scratch write.
    # TODO(synk): switch to lax.fori_loop for production H>=12 if the bundle dump
    # shows spill traffic from the unroll.
    for hh in range(num_heads):
        sl = slice(hh * hd, (hh + 1) * hd)
        qh, kh, vh = q[:, sl], k[:, sl], v[:, sl]
        s = lax.dot_general(qh, kh, (((1,), (1,)), ((), ())),
                            preferred_element_type=jnp.float32)        # (L, L) f32
        s = s - jnp.max(s, axis=-1, keepdims=True)
        p = jnp.exp(s)                                                  # unnormalized
        inv = pl.reciprocal(jnp.sum(p, axis=-1, keepdims=True), approx=True)
        pv = jnp.dot(p.astype(compute_dtype), vh,
                     preferred_element_type=jnp.float32) * inv          # (L, hd)
        pv_ref[:, sl] = pv.astype(compute_dtype)

    attn = jnp.dot(pv_ref[...], wo[...],
                   preferred_element_type=jnp.float32) + bo[...]        # (L, E) f32
    x = x + attn

    # --- MLP branch: x + c_proj(QuickGELU(c_fc(LN2(x)))) ---
    # TODO(synk): chunk the 4E hidden dim (tile wfc columns / wpr rows) for
    # production widths on v7x (64 MiB physical VMEM).
    h = _layernorm(x, ln2g[...], ln2b[...])
    f = jnp.dot(h.astype(compute_dtype), wfc[...],
                preferred_element_type=jnp.float32) + bfc[...]          # (L, 4E) f32
    f = f * jax.nn.sigmoid(1.702 * f)                                   # QuickGELU
    mlp = jnp.dot(f.astype(compute_dtype), wpr[...],
                  preferred_element_type=jnp.float32) + bpr[...]

    o_ref[...] = (x + mlp).astype(o_ref.dtype)


def _vmem_budget_bytes(weights, L, E, weight_buffers):
    """Budget the scoped VMEM limit from actual tensor sizes, capped v7x-safe."""
    wb = weight_buffers * sum(int(w.size) * w.dtype.itemsize for w in weights)
    io = 2 * 2 * L * E * 4                               # x + out tiles, double-buffered f32
    scratch = L * E * 2                                  # bf16 PV scratch
    live = (L * 3 * E + L * 4 * E + 2 * L * E) * 4       # f32 qkv / mlp-hidden / residual
    est = wb + io + scratch + live
    return int(min(max(2 * est, 32 * 1024 * 1024), 48 * 1024 * 1024))


def residual_block_pallas(x_ble, weights, num_heads):
    """x_ble: (B, L, E) float32; weights: kernel-layout list (see prep)."""
    B, L, E = x_ble.shape
    kern = functools.partial(block_kernel, num_heads=num_heads,
                             compute_dtype=jnp.bfloat16)

    def weight_spec(w, single_buffer):
        zeros = (0,) * w.ndim
        idx = lambda b, _z=zeros: _z                 # grid-invariant: no per-batch re-DMA
        if single_buffer and _WEIGHT_PIPELINE_MODE is not None:
            return pl.BlockSpec(w.shape, idx, pipeline_mode=_WEIGHT_PIPELINE_MODE)
        return pl.BlockSpec(w.shape, idx)

    def build(single_buffer):
        return pl.pallas_call(
            kern,
            out_shape=jax.ShapeDtypeStruct((B, L, E), x_ble.dtype),
            grid_spec=pltpu.PrefetchScalarGridSpec(
                num_scalar_prefetch=0,
                grid=(B,),                            # B>=2 keeps both v7x TCs busy
                in_specs=[pl.BlockSpec((None, L, E), lambda b: (b, 0, 0))]
                         + [weight_spec(w, single_buffer) for w in weights],
                out_specs=pl.BlockSpec((None, L, E), lambda b: (b, 0, 0)),
                scratch_shapes=[pltpu.VMEM((L, E), jnp.bfloat16)],
            ),
            compiler_params=pltpu.CompilerParams(
                dimension_semantics=("parallel",),
                vmem_limit_bytes=_vmem_budget_bytes(
                    weights, L, E, 1 if single_buffer else 2),
            ),
        )

    if _WEIGHT_PIPELINE_MODE is not None:
        try:
            return build(True)(x_ble, *weights)
        except Exception as e:  # pragma: no cover - version-dependent lowering path
            warnings.warn(
                "single-buffered weight BlockSpecs (pl.Buffered(1)) were rejected by "
                f"this JAX/Mosaic build ({type(e).__name__}: {e}); falling back to "
                "double-buffered weights. This doubles weight VMEM and will NOT fit "
                "production widths on v7x.")
    return build(False)(x_ble, *weights)


# ------------------------ host-side weight repacking -----------------------

def _prep_block_weights(p, num_heads):
    """Repack PyTorch-layout parameters into kernel layout (host/trace time):
    pre-transposed bf16 matmul weights, fused (E,3E) QKV with the 1/sqrt(hd)
    scale folded into the Q columns / Q bias, f32 biases & LayerNorm params."""
    E = p["w_o"].shape[0]
    hd = E // num_heads
    scale = hd ** (-0.5)
    scale_row = jnp.concatenate(
        [jnp.full((E,), scale, jnp.float32), jnp.ones((2 * E,), jnp.float32)])
    # PyTorch Linear: y = x @ W.T + b  ->  kernel uses W.T (in, out) layouts.
    wqkv = (p["w_qkv"].astype(jnp.float32).T * scale_row[None, :]).astype(jnp.bfloat16)
    bqkv = p["b_qkv"].astype(jnp.float32) * scale_row[None, :]
    return [p["ln1_g"], p["ln1_b"], wqkv, bqkv,
            p["w_o"].T, p["b_o"],
            p["ln2_g"], p["ln2_b"],
            p["w_fc"].T, p["b_fc"], p["w_pr"].T, p["b_pr"]]


# ----------------------------- model wrapper ------------------------------

def init_params(key, width, layers):
    """Deterministic synthetic parameters matching nn.MultiheadAttention /
    ResidualAttentionBlock shapes. Matmul weights stored in bfloat16."""
    E = width
    params = []
    for i in range(layers):
        ks = jax.random.split(jax.random.fold_in(key, i), 6)
        params.append(dict(
            ln1_g=jnp.ones((1, E), jnp.float32),
            ln1_b=jnp.zeros((1, E), jnp.float32),
            w_qkv=(0.02 * jax.random.normal(ks[0], (3 * E, E), jnp.float32)
                   ).astype(jnp.bfloat16),
            b_qkv=0.02 * jax.random.normal(ks[1], (1, 3 * E), jnp.float32),
            w_o=(0.02 * jax.random.normal(ks[2], (E, E), jnp.float32)
                 ).astype(jnp.bfloat16),
            b_o=jnp.zeros((1, E), jnp.float32),
            ln2_g=jnp.ones((1, E), jnp.float32),
            ln2_b=jnp.zeros((1, E), jnp.float32),
            w_fc=(0.02 * jax.random.normal(ks[3], (4 * E, E), jnp.float32)
                  ).astype(jnp.bfloat16),
            b_fc=0.02 * jax.random.normal(ks[4], (1, 4 * E), jnp.float32),
            w_pr=(0.02 * jax.random.normal(ks[5], (E, 4 * E), jnp.float32)
                  ).astype(jnp.bfloat16),
            b_pr=jnp.zeros((1, E), jnp.float32),
        ))
    return params


def transformer_forward(x_lbe, params, num_heads):
    """Matches Transformer.forward: x is (L, B, E), returns (L, B, E)."""
    # TODO(synk): prefetch layer i+1 weights across pallas_calls (P10 DMA future)
    # to hide the per-layer weight HBM traffic at small batch.
    x = jnp.transpose(x_lbe, (1, 0, 2))          # -> (B, L, E)
    for p in params:
        w = _prep_block_weights(p, num_heads)    # host-side, trace-time repack
        x = residual_block_pallas(x, w, num_heads)
    return jnp.transpose(x, (1, 0, 2))           # -> (L, B, E)


# --------------------------- pure-JAX reference ---------------------------

def _ref_block(x, p, num_heads):
    B, L, E = x.shape
    hd = E // num_heads
    scale = hd ** (-0.5)
    wqkv = p["w_qkv"].astype(jnp.float32)
    wo = p["w_o"].astype(jnp.float32)
    wfc = p["w_fc"].astype(jnp.float32)
    wpr = p["w_pr"].astype(jnp.float32)

    def ln(v, g, b):
        m = v.mean(-1, keepdims=True)
        var = ((v - m) ** 2).mean(-1, keepdims=True)
        return (v - m) / jnp.sqrt(var + 1e-5) * g[0] + b[0]

    h = ln(x, p["ln1_g"], p["ln1_b"])
    qkv = h @ wqkv.T + p["b_qkv"][0]
    q, k, v = jnp.split(qkv, 3, axis=-1)
    q = q.reshape(B, L, num_heads, hd).transpose(0, 2, 1, 3)
    k = k.reshape(B, L, num_heads, hd).transpose(0, 2, 1, 3)
    v = v.reshape(B, L, num_heads, hd).transpose(0, 2, 1, 3)
    s = jnp.einsum("bhld,bhmd->bhlm", q, k) * scale
    a = jax.nn.softmax(s, axis=-1)
    o = jnp.einsum("bhlm,bhmd->bhld", a, v).transpose(0, 2, 1, 3).reshape(B, L, E)
    x = x + o @ wo.T + p["b_o"][0]

    h = ln(x, p["ln2_g"], p["ln2_b"])
    h = h @ wfc.T + p["b_fc"][0]
    h = h * jax.nn.sigmoid(1.702 * h)
    h = h @ wpr.T + p["b_pr"][0]
    return x + h


def _ref_transformer(x_lbe, params, num_heads):
    x = jnp.transpose(x_lbe, (1, 0, 2))
    for p in params:
        x = _ref_block(x, p, num_heads)
    return jnp.transpose(x, (1, 0, 2))


# --------------------------------- main -----------------------------------

if __name__ == "__main__":
    WIDTH, LAYERS, HEADS = 32, 2, 4
    SEQ, BATCH = 8, 2

    key = jax.random.PRNGKey(0)
    kx, kp = jax.random.split(key)
    x = jax.random.normal(kx, (SEQ, BATCH, WIDTH), jnp.float32)  # (L, B, E)
    params = init_params(kp, WIDTH, LAYERS)

    out = transformer_forward(x, params, HEADS)
    out = jax.block_until_ready(out)

    ref = _ref_transformer(x, params, HEADS)
    np.testing.assert_allclose(np.asarray(out), np.asarray(ref),
                               rtol=1e-2, atol=1e-2)

    assert out.shape == (SEQ, BATCH, WIDTH)
    print("KERNEL_OK")
</pallas_src>

<mosaic_0001>
module attributes {stable_mosaic.version = 11 : i64} {
  func.func @block_kernel(%arg0: i32, %arg1: memref<1x8x32xf32, #tpu.memory_space<vmem>>, %arg2: memref<1x32xf32, #tpu.memory_space<vmem>>, %arg3: memref<1x32xf32, #tpu.memory_space<vmem>>, %arg4: memref<32x96xbf16, #tpu.memory_space<vmem>>, %arg5: memref<1x96xf32, #tpu.memory_space<vmem>>, %arg6: memref<32x32xbf16, #tpu.memory_space<vmem>>, %arg7: memref<1x32xf32, #tpu.memory_space<vmem>>, %arg8: memref<1x32xf32, #tpu.memory_space<vmem>>, %arg9: memref<1x32xf32, #tpu.memory_space<vmem>>, %arg10: memref<32x128xbf16, #tpu.memory_space<vmem>>, %arg11: memref<1x128xf32, #tpu.memory_space<vmem>>, %arg12: memref<128x32xbf16, #tpu.memory_space<vmem>>, %arg13: memref<1x32xf32, #tpu.memory_space<vmem>>, %arg14: memref<1x8x32xf32, #tpu.memory_space<vmem>>, %arg15: memref<8x32xbf16, #tpu.memory_space<vmem>>) attributes {dimension_semantics = [#tpu.dimension_semantics<parallel>], iteration_bounds = array<i64: 2>, scalar_prefetch = 0 : i64, scratch_operands = 1 : i64, tpu.core_type = #tpu.core_type<tc>, window_params = [{transform_indices = @transform_0, window_bounds = array<i64: 1, 8, 32>}, {pipeline_mode = #tpu.pipeline_mode<synchronous>, transform_indices = @transform_1, window_bounds = array<i64: 1, 32>}, {pipeline_mode = #tpu.pipeline_mode<synchronous>, transform_indices = @transform_2, window_bounds = array<i64: 1, 32>}, {pipeline_mode = #tpu.pipeline_mode<synchronous>, transform_indices = @transform_3, window_bounds = array<i64: 32, 96>}, {pipeline_mode = #tpu.pipeline_mode<synchronous>, transform_indices = @transform_4, window_bounds = array<i64: 1, 96>}, {pipeline_mode = #tpu.pipeline_mode<synchronous>, transform_indices = @transform_5, window_bounds = array<i64: 32, 32>}, {pipeline_mode = #tpu.pipeline_mode<synchronous>, transform_indices = @transform_6, window_bounds = array<i64: 1, 32>}, {pipeline_mode = #tpu.pipeline_mode<synchronous>, transform_indices = @transform_7, window_bounds = array<i64: 1, 32>}, {pipeline_mode = #tpu.pipeline_mode<synchronous>, transform_indices = @transform_8, window_bounds = array<i64: 1, 32>}, {pipeline_mode = #tpu.pipeline_mode<synchronous>, transform_indices = @transform_9, window_bounds = array<i64: 32, 128>}, {pipeline_mode = #tpu.pipeline_mode<synchronous>, transform_indices = @transform_10, window_bounds = array<i64: 1, 128>}, {pipeline_mode = #tpu.pipeline_mode<synchronous>, transform_indices = @transform_11, window_bounds = array<i64: 128, 32>}, {pipeline_mode = #tpu.pipeline_mode<synchronous>, transform_indices = @transform_12, window_bounds = array<i64: 1, 32>}, {transform_indices = @transform_13, window_bounds = array<i64: 1, 8, 32>}]} {
    %c0 = arith.constant 0 : index
    %c0_0 = arith.constant 0 : index
    %c0_1 = arith.constant 0 : index
    %0 = vector.load %arg1[%c0, %c0_0, %c0_1] : memref<1x8x32xf32, #tpu.memory_space<vmem>>, vector<1x8x32xf32>
    %1 = vector.shape_cast %0 : vector<1x8x32xf32> to vector<8x32xf32>
    %c0_2 = arith.constant 0 : index
    %c0_3 = arith.constant 0 : index
    %2 = vector.load %arg2[%c0_2, %c0_3] : memref<1x32xf32, #tpu.memory_space<vmem>>, vector<1x32xf32>
    %c0_4 = arith.constant 0 : index
    %c0_5 = arith.constant 0 : index
    %3 = vector.load %arg3[%c0_4, %c0_5] : memref<1x32xf32, #tpu.memory_space<vmem>>, vector<1x32xf32>
    %cst = arith.constant dense<0.000000e+00> : vector<8xf32>
    %4 = vector.multi_reduction <add>, %1, %cst [1] : vector<8x32xf32> to vector<8xf32>
    %5 = vector.shape_cast %4 : vector<8xf32> to vector<8x1xf32>
    %cst_6 = arith.constant 3.200000e+01 : f32
    %6 = vector.broadcast %cst_6 : f32 to vector<8x1xf32>
    %7 = arith.divf %5, %6 : vector<8x1xf32>
    %8 = vector.broadcast %7 : vector<8x1xf32> to vector<8x32xf32>
    %9 = arith.subf %1, %8 : vector<8x32xf32>
    %10 = arith.mulf %9, %9 : vector<8x32xf32>
    %cst_7 = arith.constant dense<0.000000e+00> : vector<8xf32>
    %11 = vector.multi_reduction <add>, %10, %cst_7 [1] : vector<8x32xf32> to vector<8xf32>
    %12 = vector.shape_cast %11 : vector<8xf32> to vector<8x1xf32>
    %cst_8 = arith.constant 3.200000e+01 : f32
    %13 = vector.broadcast %cst_8 : f32 to vector<8x1xf32>
    %14 = arith.divf %12, %13 : vector<8x1xf32>
    %cst_9 = arith.constant 9.99999974E-6 : f32
    %15 = vector.broadcast %cst_9 : f32 to vector<8x1xf32>
    %16 = arith.addf %14, %15 : vector<8x1xf32>
    %17 = math.rsqrt %16 : vector<8x1xf32>
    %18 = vector.broadcast %17 : vector<8x1xf32> to vector<8x32xf32>
    %19 = arith.mulf %9, %18 : vector<8x32xf32>
    %20 = vector.broadcast %2 : vector<1x32xf32> to vector<8x32xf32>
    %21 = arith.mulf %19, %20 : vector<8x32xf32>
    %22 = vector.broadcast %3 : vector<1x32xf32> to vector<8x32xf32>
    %23 = arith.addf %21, %22 : vector<8x32xf32>
    %24 = arith.truncf %23 : vector<8x32xf32> to vector<8x32xbf16>
    %c0_10 = arith.constant 0 : index
    %c0_11 = arith.constant 0 : index
    %25 = vector.load %arg4[%c0_10, %c0_11] : memref<32x96xbf16, #tpu.memory_space<vmem>>, vector<32x96xbf16>
    %cst_12 = arith.constant dense<0.000000e+00> : vector<8x96xf32>
    %26 = tpu.matmul %24, %25, %cst_12 {dimension_numbers = #tpu.dot_dimension_numbers<[1], [0], [0], [1], [0, 0, 1, 1], [], []>} : vector<8x32xbf16>, vector<32x96xbf16>, vector<8x96xf32> -> vector<8x96xf32>
    %c0_13 = arith.constant 0 : index
    %c0_14 = arith.constant 0 : index
    %27 = vector.load %arg5[%c0_13, %c0_14] : memref<1x96xf32, #tpu.memory_space<vmem>>, vector<1x96xf32>
    %28 = vector.broadcast %27 : vector<1x96xf32> to vector<8x96xf32>
    %29 = arith.addf %26, %28 : vector<8x96xf32>
    %30 = vector.extract_strided_slice %29 {offsets = [0, 0], sizes = [8, 32], strides = [1, 1]} : vector<8x96xf32> to vector<8x32xf32>
    %31 = arith.truncf %30 : vector<8x32xf32> to vector<8x32xbf16>
    %32 = vector.extract_strided_slice %29 {offsets = [0, 32], sizes = [8, 32], strides = [1, 1]} : vector<8x96xf32> to vector<8x32xf32>
    %33 = arith.truncf %32 : vector<8x32xf32> to vector<8x32xbf16>
    %34 = vector.extract_strided_slice %29 {offsets = [0, 64], sizes = [8, 32], strides = [1, 1]} : vector<8x96xf32> to vector<8x32xf32>
    %35 = arith.truncf %34 : vector<8x32xf32> to vector<8x32xbf16>
    %36 = vector.extract_strided_slice %31 {offsets = [0, 0], sizes = [8, 8], strides = [1, 1]} : vector<8x32xbf16> to vector<8x8xbf16>
    %37 = vector.extract_strided_slice %33 {offsets = [0, 0], sizes = [8, 8], strides = [1, 1]} : vector<8x32xbf16> to vector<8x8xbf16>
    %38 = vector.extract_strided_slice %35 {offsets = [0, 0], sizes = [8, 8], strides = [1, 1]} : vector<8x32xbf16> to vector<8x8xbf16>
    %cst_15 = arith.constant dense<0.000000e+00> : vector<8x8xf32>
    %39 = tpu.matmul %36, %37, %cst_15 {dimension_numbers = #tpu.dot_dimension_numbers<[1], [1], [0], [0], [0, 0, 1, 0], [], []>} : vector<8x8xbf16>, vector<8x8xbf16>, vector<8x8xf32> -> vector<8x8xf32>
    %cst_16 = arith.constant dense<0xFF800000> : vector<8xf32>
    %40 = vector.multi_reduction <maximumf>, %39, %cst_16 [1] : vector<8x8xf32> to vector<8xf32>
    %41 = vector.shape_cast %40 : vector<8xf32> to vector<8x1xf32>
    %42 = vector.broadcast %41 : vector<8x1xf32> to vector<8x8xf32>
    %43 = arith.subf %39, %42 : vector<8x8xf32>
    %44 = math.exp %43 : vector<8x8xf32>
    %cst_17 = arith.constant dense<0.000000e+00> : vector<8xf32>
    %45 = vector.multi_reduction <add>, %44, %cst_17 [1] : vector<8x8xf32> to vector<8xf32>
    %46 = vector.shape_cast %45 : vector<8xf32> to vector<8x1xf32>
    %47 = tpu.reciprocal %46 {approx = true} : vector<8x1xf32> -> vector<8x1xf32>
    %48 = arith.truncf %44 : vector<8x8xf32> to vector<8x8xbf16>
    %cst_18 = arith.constant dense<0.000000e+00> : vector<8x8xf32>
    %49 = tpu.matmul %48, %38, %cst_18 {dimension_numbers = #tpu.dot_dimension_numbers<[1], [0], [0], [1], [0, 0, 1, 1], [], []>} : vector<8x8xbf16>, vector<8x8xbf16>, vector<8x8xf32> -> vector<8x8xf32>
    %50 = vector.broadcast %47 : vector<8x1xf32> to vector<8x8xf32>
    %51 = arith.mulf %49, %50 : vector<8x8xf32>
    %52 = arith.truncf %51 : vector<8x8xf32> to vector<8x8xbf16>
    %c0_19 = arith.constant 0 : index
    %c0_20 = arith.constant 0 : index
    %53 = vector.load %arg15[%c0_19, %c0_20] : memref<8x32xbf16, #tpu.memory_space<vmem>>, vector<8x8xbf16>
    tpu.vector_store %arg15[%c0_19, %c0_20], %52 {strides = array<i32>} : memref<8x32xbf16, #tpu.memory_space<vmem>>, vector<8x8xbf16>,
    %54 = vector.extract_strided_slice %31 {offsets = [0, 8], sizes = [8, 8], strides = [1, 1]} : vector<8x32xbf16> to vector<8x8xbf16>
    %55 = vector.extract_strided_slice %33 {offsets = [0, 8], sizes = [8, 8], strides = [1, 1]} : vector<8x32xbf16> to vector<8x8xbf16>
    %56 = vector.extract_strided_slice %35 {offsets = [0, 8], sizes = [8, 8], strides = [1, 1]} : vector<8x32xbf16> to vector<8x8xbf16>
    %cst_21 = arith.constant dense<0.000000e+00> : vector<8x8xf32>
    %57 = tpu.matmul %54, %55, %cst_21 {dimension_numbers = #tpu.dot_dimension_numbers<[1], [1], [0], [0], [0, 0, 1, 0], [], []>} : vector<8x8xbf16>, vector<8x8xbf16>, vector<8x8xf32> -> vector<8x8xf32>
    %cst_22 = arith.constant dense<0xFF800000> : vector<8xf32>
    %58 = vector.multi_reduction <maximumf>, %57, %cst_22 [1] : vector<8x8xf32> to vector<8xf32>
    %59 = vector.shape_cast %58 : vector<8xf32> to vector<8x1xf32>
    %60 = vector.broadcast %59 : vector<8x1xf32> to vector<8x8xf32>
    %61 = arith.subf %57, %60 : vector<8x8xf32>
    %62 = math.exp %61 : vector<8x8xf32>
    %cst_23 = arith.constant dense<0.000000e+00> : vector<8xf32>
    %63 = vector.multi_reduction <add>, %62, %cst_23 [1] : vector<8x8xf32> to vector<8xf32>
    %64 = vector.shape_cast %63 : vector<8xf32> to vector<8x1xf32>
    %65 = tpu.reciprocal %64 {approx = true} : vector<8x1xf32> -> vector<8x1xf32>
    %66 = arith.truncf %62 : vector<8x8xf32> to vector<8x8xbf16>
    %cst_24 = arith.constant dense<0.000000e+00> : vector<8x8xf32>
    %67 = tpu.matmul %66, %56, %cst_24 {dimension_numbers = #tpu.dot_dimension_numbers<[1], [0], [0], [1], [0, 0, 1, 1], [], []>} : vector<8x8xbf16>, vector<8x8xbf16>, vector<8x8xf32> -> vector<8x8xf32>
    %68 = vector.broadcast %65 : vector<8x1xf32> to vector<8x8xf32>
    %69 = arith.mulf %67, %68 : vector<8x8xf32>
    %70 = arith.truncf %69 : vector<8x8xf32> to vector<8x8xbf16>
    %c0_25 = arith.constant 0 : index
    %c8 = arith.constant 8 : index
    %71 = vector.load %arg15[%c0_25, %c8] : memref<8x32xbf16, #tpu.memory_space<vmem>>, vector<8x8xbf16>
    tpu.vector_store %arg15[%c0_25, %c8], %70 {strides = array<i32>} : memref<8x32xbf16, #tpu.memory_space<vmem>>, vector<8x8xbf16>,
    %72 = vector.extract_strided_slice %31 {offsets = [0, 16], sizes = [8, 8], strides = [1, 1]} : vector<8x32xbf16> to vector<8x8xbf16>
    %73 = vector.extract_strided_slice %33 {offsets = [0, 16], sizes = [8, 8], strides = [1, 1]} : vector<8x32xbf16> to vector<8x8xbf16>
    %74 = vector.extract_strided_slice %35 {offsets = [0, 16], sizes = [8, 8], strides = [1, 1]} : vector<8x32xbf16> to vector<8x8xbf16>
    %cst_26 = arith.constant dense<0.000000e+00> : vector<8x8xf32>
    %75 = tpu.matmul %72, %73, %cst_26 {dimension_numbers = #tpu.dot_dimension_numbers<[1], [1], [0], [0], [0, 0, 1, 0], [], []>} : vector<8x8xbf16>, vector<8x8xbf16>, vector<8x8xf32> -> vector<8x8xf32>
    %cst_27 = arith.constant dense<0xFF800000> : vector<8xf32>
    %76 = vector.multi_reduction <maximumf>, %75, %cst_27 [1] : vector<8x8xf32> to vector<8xf32>
    %77 = vector.shape_cast %76 : vector<8xf32> to vector<8x1xf32>
    %78 = vector.broadcast %77 : vector<8x1xf32> to vector<8x8xf32>
    %79 = arith.subf %75, %78 : vector<8x8xf32>
    %80 = math.exp %79 : vector<8x8xf32>
    %cst_28 = arith.constant dense<0.000000e+00> : vector<8xf32>
    %81 = vector.multi_reduction <add>, %80, %cst_28 [1] : vector<8x8xf32> to vector<8xf32>
    %82 = vector.shape_cast %81 : vector<8xf32> to vector<8x1xf32>
    %83 = tpu.reciprocal %82 {approx = true} : vector<8x1xf32> -> vector<8x1xf32>
    %84 = arith.truncf %80 : vector<8x8xf32> to vector<8x8xbf16>
    %cst_29 = arith.constant dense<0.000000e+00> : vector<8x8xf32>
    %85 = tpu.matmul %84, %74, %cst_29 {dimension_numbers = #tpu.dot_dimension_numbers<[1], [0], [0], [1], [0, 0, 1, 1], [], []>} : vector<8x8xbf16>, vector<8x8xbf16>, vector<8x8xf32> -> vector<8x8xf32>
    %86 = vector.broadcast %83 : vector<8x1xf32> to vector<8x8xf32>
    %87 = arith.mulf %85, %86 : vector<8x8xf32>
    %88 = arith.truncf %87 : vector<8x8xf32> to vector<8x8xbf16>
    %c0_30 = arith.constant 0 : index
    %c16 = arith.constant 16 : index
    %89 = vector.load %arg15[%c0_30, %c16] : memref<8x32xbf16, #tpu.memory_space<vmem>>, vector<8x8xbf16>
    tpu.vector_store %arg15[%c0_30, %c16], %88 {strides = array<i32>} : memref<8x32xbf16, #tpu.memory_space<vmem>>, vector<8x8xbf16>,
    %90 = vector.extract_strided_slice %31 {offsets = [0, 24], sizes = [8, 8], strides = [1, 1]} : vector<8x32xbf16> to vector<8x8xbf16>
    %91 = vector.extract_strided_slice %33 {offsets = [0, 24], sizes = [8, 8], strides = [1, 1]} : vector<8x32xbf16> to vector<8x8xbf16>
    %92 = vector.extract_strided_slice %35 {offsets = [0, 24], sizes = [8, 8], strides = [1, 1]} : vector<8x32xbf16> to vector<8x8xbf16>
    %cst_31 = arith.constant dense<0.000000e+00> : vector<8x8xf32>
    %93 = tpu.matmul %90, %91, %cst_31 {dimension_numbers = #tpu.dot_dimension_numbers<[1], [1], [0], [0], [0, 0, 1, 0], [], []>} : vector<8x8xbf16>, vector<8x8xbf16>, vector<8x8xf32> -> vector<8x8xf32>
    %cst_32 = arith.constant dense<0xFF800000> : vector<8xf32>
    %94 = vector.multi_reduction <maximumf>, %93, %cst_32 [1] : vector<8x8xf32> to vector<8xf32>
    %95 = vector.shape_cast %94 : vector<8xf32> to vector<8x1xf32>
    %96 = vector.broadcast %95 : vector<8x1xf32> to vector<8x8xf32>
    %97 = arith.subf %93, %96 : vector<8x8xf32>
    %98 = math.exp %97 : vector<8x8xf32>
    %cst_33 = arith.constant dense<0.000000e+00> : vector<8xf32>
    %99 = vector.multi_reduction <add>, %98, %cst_33 [1] : vector<8x8xf32> to vector<8xf32>
    %100 = vector.shape_cast %99 : vector<8xf32> to vector<8x1xf32>
    %101 = tpu.reciprocal %100 {approx = true} : vector<8x1xf32> -> vector<8x1xf32>
    %102 = arith.truncf %98 : vector<8x8xf32> to vector<8x8xbf16>
    %cst_34 = arith.constant dense<0.000000e+00> : vector<8x8xf32>
    %103 = tpu.matmul %102, %92, %cst_34 {dimension_numbers = #tpu.dot_dimension_numbers<[1], [0], [0], [1], [0, 0, 1, 1], [], []>} : vector<8x8xbf16>, vector<8x8xbf16>, vector<8x8xf32> -> vector<8x8xf32>
    %104 = vector.broadcast %101 : vector<8x1xf32> to vector<8x8xf32>
    %105 = arith.mulf %103, %104 : vector<8x8xf32>
    %106 = arith.truncf %105 : vector<8x8xf32> to vector<8x8xbf16>
    %c0_35 = arith.constant 0 : index
    %c24 = arith.constant 24 : index
    %107 = vector.load %arg15[%c0_35, %c24] : memref<8x32xbf16, #tpu.memory_space<vmem>>, vector<8x8xbf16>
    tpu.vector_store %arg15[%c0_35, %c24], %106 {strides = array<i32>} : memref<8x32xbf16, #tpu.memory_space<vmem>>, vector<8x8xbf16>,
    %c0_36 = arith.constant 0 : index
    %c0_37 = arith.constant 0 : index
    %108 = vector.load %arg15[%c0_36, %c0_37] : memref<8x32xbf16, #tpu.memory_space<vmem>>, vector<8x32xbf16>
    %c0_38 = arith.constant 0 : index
    %c0_39 = arith.constant 0 : index
    %109 = vector.load %arg6[%c0_38, %c0_39] : memref<32x32xbf16, #tpu.memory_space<vmem>>, vector<32x32xbf16>
    %cst_40 = arith.constant dense<0.000000e+00> : vector<8x32xf32>
    %110 = tpu.matmul %108, %109, %cst_40 {dimension_numbers = #tpu.dot_dimension_numbers<[1], [0], [0], [1], [0, 0, 1, 1], [], []>} : vector<8x32xbf16>, vector<32x32xbf16>, vector<8x32xf32> -> vector<8x32xf32>
    %c0_41 = arith.constant 0 : index
    %c0_42 = arith.constant 0 : index
    %111 = vector.load %arg7[%c0_41, %c0_42] : memref<1x32xf32, #tpu.memory_space<vmem>>, vector<1x32xf32>
    %112 = vector.broadcast %111 : vector<1x32xf32> to vector<8x32xf32>
    %113 = arith.addf %110, %112 : vector<8x32xf32>
    %114 = arith.addf %1, %113 : vector<8x32xf32>
    %c0_43 = arith.constant 0 : index
    %c0_44 = arith.constant 0 : index
    %115 = vector.load %arg8[%c0_43, %c0_44] : memref<1x32xf32, #tpu.memory_space<vmem>>, vector<1x32xf32>
    %c0_45 = arith.constant 0 : index
    %c0_46 = arith.constant 0 : index
    %116 = vector.load %arg9[%c0_45, %c0_46] : memref<1x32xf32, #tpu.memory_space<vmem>>, vector<1x32xf32>
    %cst_47 = arith.constant dense<0.000000e+00> : vector<8xf32>
    %117 = vector.multi_reduction <add>, %114, %cst_47 [1] : vector<8x32xf32> to vector<8xf32>
    %118 = vector.shape_cast %117 : vector<8xf32> to vector<8x1xf32>
    %cst_48 = arith.constant 3.200000e+01 : f32
    %119 = vector.broadcast %cst_48 : f32 to vector<8x1xf32>
    %120 = arith.divf %118, %119 : vector<8x1xf32>
    %121 = vector.broadcast %120 : vector<8x1xf32> to vector<8x32xf32>
    %122 = arith.subf %114, %121 : vector<8x32xf32>
    %123 = arith.mulf %122, %122 : vector<8x32xf32>
    %cst_49 = arith.constant dense<0.000000e+00> : vector<8xf32>
    %124 = vector.multi_reduction <add>, %123, %cst_49 [1] : vector<8x32xf32> to vector<8xf32>
    %125 = vector.shape_cast %124 : vector<8xf32> to vector<8x1xf32>
    %cst_50 = arith.constant 3.200000e+01 : f32
    %126 = vector.broadcast %cst_50 : f32 to vector<8x1xf32>
    %127 = arith.divf %125, %126 : vector<8x1xf32>
    %cst_51 = arith.constant 9.99999974E-6 : f32
    %128 = vector.broadcast %cst_51 : f32 to vector<8x1xf32>
    %129 = arith.addf %127, %128 : vector<8x1xf32>
    %130 = math.rsqrt %129 : vector<8x1xf32>
    %131 = vector.broadcast %130 : vector<8x1xf32> to vector<8x32xf32>
    %132 = arith.mulf %122, %131 : vector<8x32xf32>
    %133 = vector.broadcast %115 : vector<1x32xf32> to vector<8x32xf32>
    %134 = arith.mulf %132, %133 : vector<8x32xf32>
    %135 = vector.broadcast %116 : vector<1x32xf32> to vector<8x32xf32>
    %136 = arith.addf %134, %135 : vector<8x32xf32>
    %137 = arith.truncf %136 : vector<8x32xf32> to vector<8x32xbf16>
    %c0_52 = arith.constant 0 : index
    %c0_53 = arith.constant 0 : index
    %138 = vector.load %arg10[%c0_52, %c0_53] : memref<32x128xbf16, #tpu.memory_space<vmem>>, vector<32x128xbf16>
    %cst_54 = arith.constant dense<0.000000e+00> : vector<8x128xf32>
    %139 = tpu.matmul %137, %138, %cst_54 {dimension_numbers = #tpu.dot_dimension_numbers<[1], [0], [0], [1], [0, 0, 1, 1], [], []>} : vector<8x32xbf16>, vector<32x128xbf16>, vector<8x128xf32> -> vector<8x128xf32>
    %c0_55 = arith.constant 0 : index
    %c0_56 = arith.constant 0 : index
    %140 = vector.load %arg11[%c0_55, %c0_56] : memref<1x128xf32, #tpu.memory_space<vmem>>, vector<1x128xf32>
    %141 = vector.broadcast %140 : vector<1x128xf32> to vector<8x128xf32>
    %142 = arith.addf %139, %141 : vector<8x128xf32>
    %cst_57 = arith.constant 1.702000e+00 : f32
    %143 = vector.broadcast %cst_57 : f32 to vector<8x128xf32>
    %144 = arith.mulf %143, %142 : vector<8x128xf32>
    %145 = arith.negf %144 : vector<8x128xf32>
    %146 = math.exp %145 : vector<8x128xf32>
    %cst_58 = arith.constant 1.000000e+00 : f32
    %147 = vector.broadcast %cst_58 : f32 to vector<8x128xf32>
    %148 = arith.addf %147, %146 : vector<8x128xf32>
    %149 = arith.divf %147, %148 : vector<8x128xf32>
    %150 = arith.mulf %142, %149 : vector<8x128xf32>
    %151 = arith.truncf %150 : vector<8x128xf32> to vector<8x128xbf16>
    %c0_59 = arith.constant 0 : index
    %c0_60 = arith.constant 0 : index
    %152 = vector.load %arg12[%c0_59, %c0_60] : memref<128x32xbf16, #tpu.memory_space<vmem>>, vector<128x32xbf16>
    %cst_61 = arith.constant dense<0.000000e+00> : vector<8x32xf32>
    %153 = tpu.matmul %151, %152, %cst_61 {dimension_numbers = #tpu.dot_dimension_numbers<[1], [0], [0], [1], [0, 0, 1, 1], [], []>} : vector<8x128xbf16>, vector<128x32xbf16>, vector<8x32xf32> -> vector<8x32xf32>
    %c0_62 = arith.constant 0 : index
    %c0_63 = arith.constant 0 : index
    %154 = vector.load %arg13[%c0_62, %c0_63] : memref<1x32xf32, #tpu.memory_space<vmem>>, vector<1x32xf32>
    %155 = vector.broadcast %154 : vector<1x32xf32> to vector<8x32xf32>
    %156 = arith.addf %153, %155 : vector<8x32xf32>
    %157 = arith.addf %114, %156 : vector<8x32xf32>
    %c0_64 = arith.constant 0 : index
    %c0_65 = arith.constant 0 : index
    %c0_66 = arith.constant 0 : index
    %158 = vector.load %arg14[%c0_64, %c0_65, %c0_66] : memref<1x8x32xf32, #tpu.memory_space<vmem>>, vector<1x8x32xf32>
    %159 = vector.shape_cast %158 : vector<1x8x32xf32> to vector<8x32xf32>
    %160 = vector.shape_cast %157 : vector<8x32xf32> to vector<1x8x32xf32>
    tpu.vector_store %arg14[%c0_64, %c0_65, %c0_66], %160 {strides = array<i32>} : memref<1x8x32xf32, #tpu.memory_space<vmem>>, vector<1x8x32xf32>,
    return
  }
  func.func @transform_0(%arg0: i32) -> (i32, i32, i32) {
    %c0_i32 = arith.constant 0 : i32
    %c0_i32_0 = arith.constant 0 : i32
    %c0_i32_1 = arith.constant 0 : i32
    return %arg0, %c0_i32, %c0_i32_0 : i32, i32, i32
  }
  func.func @transform_1(%arg0: i32) -> (i32, i32) {
    %c0_i32 = arith.constant 0 : i32
    %c0_i32_0 = arith.constant 0 : i32
    %c0_i32_1 = arith.constant 0 : i32
    return %c0_i32, %c0_i32_0 : i32, i32
  }
  func.func @transform_2(%arg0: i32) -> (i32, i32) {
    %c0_i32 = arith.constant 0 : i32
    %c0_i32_0 = arith.constant 0 : i32
    %c0_i32_1 = arith.constant 0 : i32
    return %c0_i32, %c0_i32_0 : i32, i32
  }
  func.func @transform_3(%arg0: i32) -> (i32, i32) {
    %c0_i32 = arith.constant 0 : i32
    %c0_i32_0 = arith.constant 0 : i32
    %c0_i32_1 = arith.constant 0 : i32
    return %c0_i32, %c0_i32_0 : i32, i32
  }
  func.func @transform_4(%arg0: i32) -> (i32, i32) {
    %c0_i32 = arith.constant 0 : i32
    %c0_i32_0 = arith.constant 0 : i32
    %c0_i32_1 = arith.constant 0 : i32
    return %c0_i32, %c0_i32_0 : i32, i32
  }
  func.func @transform_5(%arg0: i32) -> (i32, i32) {
    %c0_i32 = arith.constant 0 : i32
    %c0_i32_0 = arith.constant 0 : i32
    %c0_i32_1 = arith.constant 0 : i32
    return %c0_i32, %c0_i32_0 : i32, i32
  }
  func.func @transform_6(%arg0: i32) -> (i32, i32) {
    %c0_i32 = arith.constant 0 : i32
    %c0_i32_0 = arith.constant 0 : i32
    %c0_i32_1 = arith.constant 0 : i32
    return %c0_i32, %c0_i32_0 : i32, i32
  }
  func.func @transform_7(%arg0: i32) -> (i32, i32) {
    %c0_i32 = arith.constant 0 : i32
    %c0_i32_0 = arith.constant 0 : i32
    %c0_i32_1 = arith.constant 0 : i32
    return %c0_i32, %c0_i32_0 : i32, i32
  }
  func.func @transform_8(%arg0: i32) -> (i32, i32) {
    %c0_i32 = arith.constant 0 : i32
    %c0_i32_0 = arith.constant 0 : i32
    %c0_i32_1 = arith.constant 0 : i32
    return %c0_i32, %c0_i32_0 : i32, i32
  }
  func.func @transform_9(%arg0: i32) -> (i32, i32) {
    %c0_i32 = arith.constant 0 : i32
    %c0_i32_0 = arith.constant 0 : i32
    %c0_i32_1 = arith.constant 0 : i32
    return %c0_i32, %c0_i32_0 : i32, i32
  }
  func.func @transform_10(%arg0: i32) -> (i32, i32) {
    %c0_i32 = arith.constant 0 : i32
    %c0_i32_0 = arith.constant 0 : i32
    %c0_i32_1 = arith.constant 0 : i32
    return %c0_i32, %c0_i32_0 : i32, i32
  }
  func.func @transform_11(%arg0: i32) -> (i32, i32) {
    %c0_i32 = arith.constant 0 : i32
    %c0_i32_0 = arith.constant 0 : i32
    %c0_i32_1 = arith.constant 0 : i32
    return %c0_i32, %c0_i32_0 : i32, i32
  }
  func.func @transform_12(%arg0: i32) -> (i32, i32) {
    %c0_i32 = arith.constant 0 : i32
    %c0_i32_0 = arith.constant 0 : i32
    %c0_i32_1 = arith.constant 0 : i32
    return %c0_i32, %c0_i32_0 : i32, i32
  }
  func.func @transform_13(%arg0: i32) -> (i32, i32, i32) {
    %c0_i32 = arith.constant 0 : i32
    %c0_i32_0 = arith.constant 0 : i32
    %c0_i32_1 = arith.constant 0 : i32
    return %arg0, %c0_i32, %c0_i32_0 : i32, i32, i32
  }
}

module attributes {stable_mosaic.version = 11 : i64} {
  func.func @block_kernel(%arg0: i32, %arg1: memref<1x8x32xf32, #tpu.memory_space<vmem>>, %arg2: memref<1x32xf32, #tpu.memory_space<vmem>>, %arg3: memref<1x32xf32, #tpu.memory_space<vmem>>, %arg4: memref<32x96xbf16, #tpu.memory_space<vmem>>, %arg5: memref<1x96xf32, #tpu.memory_space<vmem>>, %arg6: memref<32x32xbf16, #tpu.memory_space<vmem>>, %arg7: memref<1x32xf32, #tpu.memory_space<vmem>>, %arg8: memref<1x32xf32, #tpu.memory_space<vmem>>, %arg9: memref<1x32xf32, #tpu.memory_space<vmem>>, %arg10: memref<32x128xbf16, #tpu.memory_space<vmem>>, %arg11: memref<1x128xf32, #tpu.memory_space<vmem>>, %arg12: memref<128x32xbf16, #tpu.memory_space<vmem>>, %arg13: memref<1x32xf32, #tpu.memory_space<vmem>>, %arg14: memref<1x8x32xf32, #tpu.memory_space<vmem>>, %arg15: memref<8x32xbf16, #tpu.memory_space<vmem>>) attributes {dimension_semantics = [#tpu.dimension_semantics<parallel>], iteration_bounds = array<i64: 2>, scalar_prefetch = 0 : i64, scratch_operands = 1 : i64, tpu.core_type = #tpu.core_type<tc>, window_params = [{transform_indices = @transform_0, window_bounds = array<i64: 1, 8, 32>}, {pipeline_mode = #tpu.pipeline_mode<synchronous>, transform_indices = @transform_1, window_bounds = array<i64: 1, 32>}, {pipeline_mode = #tpu.pipeline_mode<synchronous>, transform_indices = @transform_2, window_bounds = array<i64: 1, 32>}, {pipeline_mode = #tpu.pipeline_mode<synchronous>, transform_indices = @transform_3, window_bounds = array<i64: 32, 96>}, {pipeline_mode = #tpu.pipeline_mode<synchronous>, transform_indices = @transform_4, window_bounds = array<i64: 1, 96>}, {pipeline_mode = #tpu.pipeline_mode<synchronous>, transform_indices = @transform_5, window_bounds = array<i64: 32, 32>}, {pipeline_mode = #tpu.pipeline_mode<synchronous>, transform_indices = @transform_6, window_bounds = array<i64: 1, 32>}, {pipeline_mode = #tpu.pipeline_mode<synchronous>, transform_indices = @transform_7, window_bounds = array<i64: 1, 32>}, {pipeline_mode = #tpu.pipeline_mode<synchronous>, transform_indices = @transform_8, window_bounds = array<i64: 1, 32>}, {pipeline_mode = #tpu.pipeline_mode<synchronous>, transform_indices = @transform_9, window_bounds = array<i64: 32, 128>}, {pipeline_mode = #tpu.pipeline_mode<synchronous>, transform_indices = @transform_10, window_bounds = array<i64: 1, 128>}, {pipeline_mode = #tpu.pipeline_mode<synchronous>, transform_indices = @transform_11, window_bounds = array<i64: 128, 32>}, {pipeline_mode = #tpu.pipeline_mode<synchronous>, transform_indices = @transform_12, window_bounds = array<i64: 1, 32>}, {transform_indices = @transform_13, window_bounds = array<i64: 1, 8, 32>}]} {
    %c0 = arith.constant 0 : index
    %c0_0 = arith.constant 0 : index
    %c0_1 = arith.constant 0 : index
    %0 = vector.load %arg1[%c0, %c0_0, %c0_1] : memref<1x8x32xf32, #tpu.memory_space<vmem>>, vector<1x8x32xf32>
    %1 = vector.shape_cast %0 : vector<1x8x32xf32> to vector<8x32xf32>
    %c0_2 = arith.constant 0 : index
    %c0_3 = arith.constant 0 : index
    %2 = vector.load %arg2[%c0_2, %c0_3] : memref<1x32xf32, #tpu.memory_space<vmem>>, vector<1x32xf32>
    %c0_4 = arith.constant 0 : index
    %c0_5 = arith.constant 0 : index
    %3 = vector.load %arg3[%c0_4, %c0_5] : memref<1x32xf32, #tpu.memory_space<vmem>>, vector<1x32xf32>
    %cst = arith.constant dense<0.000000e+00> : vector<8xf32>
    %4 = vector.multi_reduction <add>, %1, %cst [1] : vector<8x32xf32> to vector<8xf32>
    %5 = vector.shape_cast %4 : vector<8xf32> to vector<8x1xf32>
    %cst_6 = arith.constant 3.200000e+01 : f32
    %6 = vector.broadcast %cst_6 : f32 to vector<8x1xf32>
    %7 = arith.divf %5, %6 : vector<8x1xf32>
    %8 = vector.broadcast %7 : vector<8x1xf32> to vector<8x32xf32>
    %9 = arith.subf %1, %8 : vector<8x32xf32>
    %10 = arith.mulf %9, %9 : vector<8x32xf32>
    %cst_7 = arith.constant dense<0.000000e+00> : vector<8xf32>
    %11 = vector.multi_reduction <add>, %10, %cst_7 [1] : vector<8x32xf32> to vector<8xf32>
    %12 = vector.shape_cast %11 : vector<8xf32> to vector<8x1xf32>
    %cst_8 = arith.constant 3.200000e+01 : f32
    %13 = vector.broadcast %cst_8 : f32 to vector<8x1xf32>
    %14 = arith.divf %12, %13 : vector<8x1xf32>
    %cst_9 = arith.constant 9.99999974E-6 : f32
    %15 = vector.broadcast %cst_9 : f32 to vector<8x1xf32>
    %16 = arith.addf %14, %15 : vector<8x1xf32>
    %17 = math.rsqrt %16 : vector<8x1xf32>
    %18 = vector.broadcast %17 : vector<8x1xf32> to vector<8x32xf32>
    %19 = arith.mulf %9, %18 : vector<8x32xf32>
    %20 = vector.broadcast %2 : vector<1x32xf32> to vector<8x32xf32>
    %21 = arith.mulf %19, %20 : vector<8x32xf32>
    %22 = vector.broadcast %3 : vector<1x32xf32> to vector<8x32xf32>
    %23 = arith.addf %21, %22 : vector<8x32xf32>
    %24 = arith.truncf %23 : vector<8x32xf32> to vector<8x32xbf16>
    %c0_10 = arith.constant 0 : index
    %c0_11 = arith.constant 0 : index
    %25 = vector.load %arg4[%c0_10, %c0_11] : memref<32x96xbf16, #tpu.memory_space<vmem>>, vector<32x96xbf16>
    %cst_12 = arith.constant dense<0.000000e+00> : vector<8x96xf32>
    %26 = tpu.matmul %24, %25, %cst_12 {dimension_numbers = #tpu.dot_dimension_numbers<[1], [0], [0], [1], [0, 0, 1, 1], [], []>} : vector<8x32xbf16>, vector<32x96xbf16>, vector<8x96xf32> -> vector<8x96xf32>
    %c0_13 = arith.constant 0 : index
    %c0_14 = arith.constant 0 : index
    %27 = vector.load %arg5[%c0_13, %c0_14] : memref<1x96xf32, #tpu.memory_space<vmem>>, vector<1x96xf32>
    %28 = vector.broadcast %27 : vector<1x96xf32> to vector<8x96xf32>
    %29 = arith.addf %26, %28 : vector<8x96xf32>
    %30 = vector.extract_strided_slice %29 {offsets = [0, 0], sizes = [8, 32], strides = [1, 1]} : vector<8x96xf32> to vector<8x32xf32>
    %31 = arith.truncf %30 : vector<8x32xf32> to vector<8x32xbf16>
    %32 = vector.extract_strided_slice %29 {offsets = [0, 32], sizes = [8, 32], strides = [1, 1]} : vector<8x96xf32> to vector<8x32xf32>
    %33 = arith.truncf %32 : vector<8x32xf32> to vector<8x32xbf16>
    %34 = vector.extract_strided_slice %29 {offsets = [0, 64], sizes = [8, 32], strides = [1, 1]} : vector<8x96xf32> to vector<8x32xf32>
    %35 = arith.truncf %34 : vector<8x32xf32> to vector<8x32xbf16>
    %36 = vector.extract_strided_slice %31 {offsets = [0, 0], sizes = [8, 8], strides = [1, 1]} : vector<8x32xbf16> to vector<8x8xbf16>
    %37 = vector.extract_strided_slice %33 {offsets = [0, 0], sizes = [8, 8], strides = [1, 1]} : vector<8x32xbf16> to vector<8x8xbf16>
    %38 = vector.extract_strided_slice %35 {offsets = [0, 0], sizes = [8, 8], strides = [1, 1]} : vector<8x32xbf16> to vector<8x8xbf16>
    %cst_15 = arith.constant dense<0.000000e+00> : vector<8x8xf32>
    %39 = tpu.matmul %36, %37, %cst_15 {dimension_numbers = #tpu.dot_dimension_numbers<[1], [1], [0], [0], [0, 0, 1, 0], [], []>} : vector<8x8xbf16>, vector<8x8xbf16>, vector<8x8xf32> -> vector<8x8xf32>
    %cst_16 = arith.constant dense<0xFF800000> : vector<8xf32>
    %40 = vector.multi_reduction <maximumf>, %39, %cst_16 [1] : vector<8x8xf32> to vector<8xf32>
    %41 = vector.shape_cast %40 : vector<8xf32> to vector<8x1xf32>
    %42 = vector.broadcast %41 : vector<8x1xf32> to vector<8x8xf32>
    %43 = arith.subf %39, %42 : vector<8x8xf32>
    %44 = math.exp %43 : vector<8x8xf32>
    %cst_17 = arith.constant dense<0.000000e+00> : vector<8xf32>
    %45 = vector.multi_reduction <add>, %44, %cst_17 [1] : vector<8x8xf32> to vector<8xf32>
    %46 = vector.shape_cast %45 : vector<8xf32> to vector<8x1xf32>
    %47 = tpu.reciprocal %46 {approx = true} : vector<8x1xf32> -> vector<8x1xf32>
    %48 = arith.truncf %44 : vector<8x8xf32> to vector<8x8xbf16>
    %cst_18 = arith.constant dense<0.000000e+00> : vector<8x8xf32>
    %49 = tpu.matmul %48, %38, %cst_18 {dimension_numbers = #tpu.dot_dimension_numbers<[1], [0], [0], [1], [0, 0, 1, 1], [], []>} : vector<8x8xbf16>, vector<8x8xbf16>, vector<8x8xf32> -> vector<8x8xf32>
    %50 = vector.broadcast %47 : vector<8x1xf32> to vector<8x8xf32>
    %51 = arith.mulf %49, %50 : vector<8x8xf32>
    %52 = arith.truncf %51 : vector<8x8xf32> to vector<8x8xbf16>
    %c0_19 = arith.constant 0 : index
    %c0_20 = arith.constant 0 : index
    %53 = vector.load %arg15[%c0_19, %c0_20] : memref<8x32xbf16, #tpu.memory_space<vmem>>, vector<8x8xbf16>
    tpu.vector_store %arg15[%c0_19, %c0_20], %52 {strides = array<i32>} : memref<8x32xbf16, #tpu.memory_space<vmem>>, vector<8x8xbf16>,
    %54 = vector.extract_strided_slice %31 {offsets = [0, 8], sizes = [8, 8], strides = [1, 1]} : vector<8x32xbf16> to vector<8x8xbf16>
    %55 = vector.extract_strided_slice %33 {offsets = [0, 8], sizes = [8, 8], strides = [1, 1]} : vector<8x32xbf16> to vector<8x8xbf16>
    %56 = vector.extract_strided_slice %35 {offsets = [0, 8], sizes = [8, 8], strides = [1, 1]} : vector<8x32xbf16> to vector<8x8xbf16>
    %cst_21 = arith.constant dense<0.000000e+00> : vector<8x8xf32>
    %57 = tpu.matmul %54, %55, %cst_21 {dimension_numbers = #tpu.dot_dimension_numbers<[1], [1], [0], [0], [0, 0, 1, 0], [], []>} : vector<8x8xbf16>, vector<8x8xbf16>, vector<8x8xf32> -> vector<8x8xf32>
    %cst_22 = arith.constant dense<0xFF800000> : vector<8xf32>
    %58 = vector.multi_reduction <maximumf>, %57, %cst_22 [1] : vector<8x8xf32> to vector<8xf32>
    %59 = vector.shape_cast %58 : vector<8xf32> to vector<8x1xf32>
    %60 = vector.broadcast %59 : vector<8x1xf32> to vector<8x8xf32>
    %61 = arith.subf %57, %60 : vector<8x8xf32>
    %62 = math.exp %61 : vector<8x8xf32>
    %cst_23 = arith.constant dense<0.000000e+00> : vector<8xf32>
    %63 = vector.multi_reduction <add>, %62, %cst_23 [1] : vector<8x8xf32> to vector<8xf32>
    %64 = vector.shape_cast %63 : vector<8xf32> to vector<8x1xf32>
    %65 = tpu.reciprocal %64 {approx = true} : vector<8x1xf32> -> vector<8x1xf32>
    %66 = arith.truncf %62 : vector<8x8xf32> to vector<8x8xbf16>
    %cst_24 = arith.constant dense<0.000000e+00> : vector<8x8xf32>
    %67 = tpu.matmul %66, %56, %cst_24 {dimension_numbers = #tpu.dot_dimension_numbers<[1], [0], [0], [1], [0, 0, 1, 1], [], []>} : vector<8x8xbf16>, vector<8x8xbf16>, vector<8x8xf32> -> vector<8x8xf32>
    %68 = vector.broadcast %65 : vector<8x1xf32> to vector<8x8xf32>
    %69 = arith.mulf %67, %68 : vector<8x8xf32>
    %70 = arith.truncf %69 : vector<8x8xf32> to vector<8x8xbf16>
    %c0_25 = arith.constant 0 : index
    %c8 = arith.constant 8 : index
    %71 = vector.load %arg15[%c0_25, %c8] : memref<8x32xbf16, #tpu.memory_space<vmem>>, vector<8x8xbf16>
    tpu.vector_store %arg15[%c0_25, %c8], %70 {strides = array<i32>} : memref<8x32xbf16, #tpu.memory_space<vmem>>, vector<8x8xbf16>,
    %72 = vector.extract_strided_slice %31 {offsets = [0, 16], sizes = [8, 8], strides = [1, 1]} : vector<8x32xbf16> to vector<8x8xbf16>
    %73 = vector.extract_strided_slice %33 {offsets = [0, 16], sizes = [8, 8], strides = [1, 1]} : vector<8x32xbf16> to vector<8x8xbf16>
    %74 = vector.extract_strided_slice %35 {offsets = [0, 16], sizes = [8, 8], strides = [1, 1]} : vector<8x32xbf16> to vector<8x8xbf16>
    %cst_26 = arith.constant dense<0.000000e+00> : vector<8x8xf32>
    %75 = tpu.matmul %72, %73, %cst_26 {dimension_numbers = #tpu.dot_dimension_numbers<[1], [1], [0], [0], [0, 0, 1, 0], [], []>} : vector<8x8xbf16>, vector<8x8xbf16>, vector<8x8xf32> -> vector<8x8xf32>
    %cst_27 = arith.constant dense<0xFF800000> : vector<8xf32>
    %76 = vector.multi_reduction <maximumf>, %75, %cst_27 [1] : vector<8x8xf32> to vector<8xf32>
    %77 = vector.shape_cast %76 : vector<8xf32> to vector<8x1xf32>
    %78 = vector.broadcast %77 : vector<8x1xf32> to vector<8x8xf32>
    %79 = arith.subf %75, %78 : vector<8x8xf32>
    %80 = math.exp %79 : vector<8x8xf32>
    %cst_28 = arith.constant dense<0.000000e+00> : vector<8xf32>
    %81 = vector.multi_reduction <add>, %80, %cst_28 [1] : vector<8x8xf32> to vector<8xf32>
    %82 = vector.shape_cast %81 : vector<8xf32> to vector<8x1xf32>
    %83 = tpu.reciprocal %82 {approx = true} : vector<8x1xf32> -> vector<8x1xf32>
    %84 = arith.truncf %80 : vector<8x8xf32> to vector<8x8xbf16>
    %cst_29 = arith.constant dense<0.000000e+00> : vector<8x8xf32>
    %85 = tpu.matmul %84, %74, %cst_29 {dimension_numbers = #tpu.dot_dimension_numbers<[1], [0], [0], [1], [0, 0, 1, 1], [], []>} : vector<8x8xbf16>, vector<8x8xbf16>, vector<8x8xf32> -> vector<8x8xf32>
    %86 = vector.broadcast %83 : vector<8x1xf32> to vector<8x8xf32>
    %87 = arith.mulf %85, %86 : vector<8x8xf32>
    %88 = arith.truncf %87 : vector<8x8xf32> to vector<8x8xbf16>
    %c0_30 = arith.constant 0 : index
    %c16 = arith.constant 16 : index
    %89 = vector.load %arg15[%c0_30, %c16] : memref<8x32xbf16, #tpu.memory_space<vmem>>, vector<8x8xbf16>
    tpu.vector_store %arg15[%c0_30, %c16], %88 {strides = array<i32>} : memref<8x32xbf16, #tpu.memory_space<vmem>>, vector<8x8xbf16>,
    %90 = vector.extract_strided_slice %31 {offsets = [0, 24], sizes = [8, 8], strides = [1, 1]} : vector<8x32xbf16> to vector<8x8xbf16>
    %91 = vector.extract_strided_slice %33 {offsets = [0, 24], sizes = [8, 8], strides = [1, 1]} : vector<8x32xbf16> to vector<8x8xbf16>
    %92 = vector.extract_strided_slice %35 {offsets = [0, 24], sizes = [8, 8], strides = [1, 1]} : vector<8x32xbf16> to vector<8x8xbf16>
    %cst_31 = arith.constant dense<0.000000e+00> : vector<8x8xf32>
    %93 = tpu.matmul %90, %91, %cst_31 {dimension_numbers = #tpu.dot_dimension_numbers<[1], [1], [0], [0], [0, 0, 1, 0], [], []>} : vector<8x8xbf16>, vector<8x8xbf16>, vector<8x8xf32> -> vector<8x8xf32>
    %cst_32 = arith.constant dense<0xFF800000> : vector<8xf32>
    %94 = vector.multi_reduction <maximumf>, %93, %cst_32 [1] : vector<8x8xf32> to vector<8xf32>
    %95 = vector.shape_cast %94 : vector<8xf32> to vector<8x1xf32>
    %96 = vector.broadcast %95 : vector<8x1xf32> to vector<8x8xf32>
    %97 = arith.subf %93, %96 : vector<8x8xf32>
    %98 = math.exp %97 : vector<8x8xf32>
    %cst_33 = arith.constant dense<0.000000e+00> : vector<8xf32>
    %99 = vector.multi_reduction <add>, %98, %cst_33 [1] : vector<8x8xf32> to vector<8xf32>
    %100 = vector.shape_cast %99 : vector<8xf32> to vector<8x1xf32>
    %101 = tpu.reciprocal %100 {approx = true} : vector<8x1xf32> -> vector<8x1xf32>
    %102 = arith.truncf %98 : vector<8x8xf32> to vector<8x8xbf16>
    %cst_34 = arith.constant dense<0.000000e+00> : vector<8x8xf32>
    %103 = tpu.matmul %102, %92, %cst_34 {dimension_numbers = #tpu.dot_dimension_numbers<[1], [0], [0], [1], [0, 0, 1, 1], [], []>} : vector<8x8xbf16>, vector<8x8xbf16>, vector<8x8xf32> -> vector<8x8xf32>
    %104 = vector.broadcast %101 : vector<8x1xf32> to vector<8x8xf32>
    %105 = arith.mulf %103, %104 : vector<8x8xf32>
    %106 = arith.truncf %105 : vector<8x8xf32> to vector<8x8xbf16>
    %c0_35 = arith.constant 0 : index
    %c24 = arith.constant 24 : index
    %107 = vector.load %arg15[%c0_35, %c24] : memref<8x32xbf16, #tpu.memory_space<vmem>>, vector<8x8xbf16>
    tpu.vector_store %arg15[%c0_35, %c24], %106 {strides = array<i32>} : memref<8x32xbf16, #tpu.memory_space<vmem>>, vector<8x8xbf16>,
    %c0_36 = arith.constant 0 : index
    %c0_37 = arith.constant 0 : index
    %108 = vector.load %arg15[%c0_36, %c0_37] : memref<8x32xbf16, #tpu.memory_space<vmem>>, vector<8x32xbf16>
    %c0_38 = arith.constant 0 : index
    %c0_39 = arith.constant 0 : index
    %109 = vector.load %arg6[%c0_38, %c0_39] : memref<32x32xbf16, #tpu.memory_space<vmem>>, vector<32x32xbf16>
    %cst_40 = arith.constant dense<0.000000e+00> : vector<8x32xf32>
    %110 = tpu.matmul %108, %109, %cst_40 {dimension_numbers = #tpu.dot_dimension_numbers<[1], [0], [0], [1], [0, 0, 1, 1], [], []>} : vector<8x32xbf16>, vector<32x32xbf16>, vector<8x32xf32> -> vector<8x32xf32>
    %c0_41 = arith.constant 0 : index
    %c0_42 = arith.constant 0 : index
    %111 = vector.load %arg7[%c0_41, %c0_42] : memref<1x32xf32, #tpu.memory_space<vmem>>, vector<1x32xf32>
    %112 = vector.broadcast %111 : vector<1x32xf32> to vector<8x32xf32>
    %113 = arith.addf %110, %112 : vector<8x32xf32>
    %114 = arith.addf %1, %113 : vector<8x32xf32>
    %c0_43 = arith.constant 0 : index
    %c0_44 = arith.constant 0 : index
    %115 = vector.load %arg8[%c0_43, %c0_44] : memref<1x32xf32, #tpu.memory_space<vmem>>, vector<1x32xf32>
    %c0_45 = arith.constant 0 : index
    %c0_46 = arith.constant 0 : index
    %116 = vector.load %arg9[%c0_45, %c0_46] : memref<1x32xf32, #tpu.memory_space<vmem>>, vector<1x32xf32>
    %cst_47 = arith.constant dense<0.000000e+00> : vector<8xf32>
    %117 = vector.multi_reduction <add>, %114, %cst_47 [1] : vector<8x32xf32> to vector<8xf32>
    %118 = vector.shape_cast %117 : vector<8xf32> to vector<8x1xf32>
    %cst_48 = arith.constant 3.200000e+01 : f32
    %119 = vector.broadcast %cst_48 : f32 to vector<8x1xf32>
    %120 = arith.divf %118, %119 : vector<8x1xf32>
    %121 = vector.broadcast %120 : vector<8x1xf32> to vector<8x32xf32>
    %122 = arith.subf %114, %121 : vector<8x32xf32>
    %123 = arith.mulf %122, %122 : vector<8x32xf32>
    %cst_49 = arith.constant dense<0.000000e+00> : vector<8xf32>
    %124 = vector.multi_reduction <add>, %123, %cst_49 [1] : vector<8x32xf32> to vector<8xf32>
    %125 = vector.shape_cast %124 : vector<8xf32> to vector<8x1xf32>
    %cst_50 = arith.constant 3.200000e+01 : f32
    %126 = vector.broadcast %cst_50 : f32 to vector<8x1xf32>
    %127 = arith.divf %125, %126 : vector<8x1xf32>
    %cst_51 = arith.constant 9.99999974E-6 : f32
    %128 = vector.broadcast %cst_51 : f32 to vector<8x1xf32>
    %129 = arith.addf %127, %128 : vector<8x1xf32>
    %130 = math.rsqrt %129 : vector<8x1xf32>
    %131 = vector.broadcast %130 : vector<8x1xf32> to vector<8x32xf32>
    %132 = arith.mulf %122, %131 : vector<8x32xf32>
    %133 = vector.broadcast %115 : vector<1x32xf32> to vector<8x32xf32>
    %134 = arith.mulf %132, %133 : vector<8x32xf32>
    %135 = vector.broadcast %116 : vector<1x32xf32> to vector<8x32xf32>
    %136 = arith.addf %134, %135 : vector<8x32xf32>
    %137 = arith.truncf %136 : vector<8x32xf32> to vector<8x32xbf16>
    %c0_52 = arith.constant 0 : index
    %c0_53 = arith.constant 0 : index
    %138 = vector.load %arg10[%c0_52, %c0_53] : memref<32x128xbf16, #tpu.memory_space<vmem>>, vector<32x128xbf16>
    %cst_54 = arith.constant dense<0.000000e+00> : vector<8x128xf32>
    %139 = tpu.matmul %137, %138, %cst_54 {dimension_numbers = #tpu.dot_dimension_numbers<[1], [0], [0], [1], [0, 0, 1, 1], [], []>} : vector<8x32xbf16>, vector<32x128xbf16>, vector<8x128xf32> -> vector<8x128xf32>
    %c0_55 = arith.constant 0 : index
    %c0_56 = arith.constant 0 : index
    %140 = vector.load %arg11[%c0_55, %c0_56] : memref<1x128xf32, #tpu.memory_space<vmem>>, vector<1x128xf32>
    %141 = vector.broadcast %140 : vector<1x128xf32> to vector<8x128xf32>
    %142 = arith.addf %139, %141 : vector<8x128xf32>
    %cst_57 = arith.constant 1.702000e+00 : f32
    %143 = vector.broadcast %cst_57 : f32 to vector<8x128xf32>
    %144 = arith.mulf %143, %142 : vector<8x128xf32>
    %145 = arith.negf %144 : vector<8x128xf32>
    %146 = math.exp %145 : vector<8x128xf32>
    %cst_58 = arith.constant 1.000000e+00 : f32
    %147 = vector.broadcast %cst_58 : f32 to vector<8x128xf32>
    %148 = arith.addf %147, %146 : vector<8x128xf32>
    %149 = arith.divf %147, %148 : vector<8x128xf32>
    %150 = arith.mulf %142, %149 : vector<8x128xf32>
    %151 = arith.truncf %150 : vector<8x128xf32> to vector<8x128xbf16>
    %c0_59 = arith.constant 0 : index
    %c0_60 = arith.constant 0 : index
    %152 = vector.load %arg12[%c0_59, %c0_60] : memref<128x32xbf16, #tpu.memory_space<vmem>>, vector<128x32xbf16>
    %cst_61 = arith.constant dense<0.000000e+00> : vector<8x32xf32>
    %153 = tpu.matmul %151, %152, %cst_61 {dimension_numbers = #tpu.dot_dimension_numbers<[1], [0], [0], [1], [0, 0, 1, 1], [], []>} : vector<8x128xbf16>, vector<128x32xbf16>, vector<8x32xf32> -> vector<8x32xf32>
    %c0_62 = arith.constant 0 : index
    %c0_63 = arith.constant 0 : index
    %154 = vector.load %arg13[%c0_62, %c0_63] : memref<1x32xf32, #tpu.memory_space<vmem>>, vector<1x32xf32>
    %155 = vector.broadcast %154 : vector<1x32xf32> to vector<8x32xf32>
    %156 = arith.addf %153, %155 : vector<8x32xf32>
    %157 = arith.addf %114, %156 : vector<8x32xf32>
    %c0_64 = arith.constant 0 : index
    %c0_65 = arith.constant 0 : index
    %c0_66 = arith.constant 0 : index
    %158 = vector.load %arg14[%c0_64, %c0_65, %c0_66] : memref<1x8x32xf32, #tpu.memory_space<vmem>>, vector<1x8x32xf32>
    %159 = vector.shape_cast %158 : vector<1x8x32xf32> to vector<8x32xf32>
    %160 = vector.shape_cast %157 : vector<8x32xf32> to vector<1x8x32xf32>
    tpu.vector_store %arg14[%c0_64, %c0_65, %c0_66], %160 {strides = array<i32>} : memref<1x8x32xf32, #tpu.memory_space<vmem>>, vector<1x8x32xf32>,
    return
  }
  func.func @transform_0(%arg0: i32) -> (i32, i32, i32) {
    %c0_i32 = arith.constant 0 : i32
    %c0_i32_0 = arith.constant 0 : i32
    %c0_i32_1 = arith.constant 0 : i32
    return %arg0, %c0_i32, %c0_i32_0 : i32, i32, i32
  }
  func.func @transform_1(%arg0: i32) -> (i32, i32) {
    %c0_i32 = arith.constant 0 : i32
    %c0_i32_0 = arith.constant 0 : i32
    %c0_i32_1 = arith.constant 0 : i32
    return %c0_i32, %c0_i32_0 : i32, i32
  }
  func.func @transform_2(%arg0: i32) -> (i32, i32) {
    %c0_i32 = arith.constant 0 : i32
    %c0_i32_0 = arith.constant 0 : i32
    %c0_i32_1 = arith.constant 0 : i32
    return %c0_i32, %c0_i32_0 : i32, i32
  }
  func.func @transform_3(%arg0: i32) -> (i32, i32) {
    %c0_i32 = arith.constant 0 : i32
    %c0_i32_0 = arith.constant 0 : i32
    %c0_i32_1 = arith.constant 0 : i32
    return %c0_i32, %c0_i32_0 : i32, i32
  }
  func.func @transform_4(%arg0: i32) -> (i32, i32) {
    %c0_i32 = arith.constant 0 : i32
    %c0_i32_0 = arith.constant 0 : i32
    %c0_i32_1 = arith.constant 0 : i32
    return %c0_i32, %c0_i32_0 : i32, i32
  }
  func.func @transform_5(%arg0: i32) -> (i32, i32) {
    %c0_i32 = arith.constant 0 : i32
    %c0_i32_0 = arith.constant 0 : i32
    %c0_i32_1 = arith.constant 0 : i32
    return %c0_i32, %c0_i32_0 : i32, i32
  }
  func.func @transform_6(%arg0: i32) -> (i32, i32) {
    %c0_i32 = arith.constant 0 : i32
    %c0_i32_0 = arith.constant 0 : i32
    %c0_i32_1 = arith.constant 0 : i32
    return %c0_i32, %c0_i32_0 : i32, i32
  }
  func.func @transform_7(%arg0: i32) -> (i32, i32) {
    %c0_i32 = arith.constant 0 : i32
    %c0_i32_0 = arith.constant 0 : i32
    %c0_i32_1 = arith.constant 0 : i32
    return %c0_i32, %c0_i32_0 : i32, i32
  }
  func.func @transform_8(%arg0: i32) -> (i32, i32) {
    %c0_i32 = arith.constant 0 : i32
    %c0_i32_0 = arith.constant 0 : i32
    %c0_i32_1 = arith.constant 0 : i32
    return %c0_i32, %c0_i32_0 : i32, i32
  }
  func.func @transform_9(%arg0: i32) -> (i32, i32) {
    %c0_i32 = arith.constant 0 : i32
    %c0_i32_0 = arith.constant 0 : i32
    %c0_i32_1 = arith.constant 0 : i32
    return %c0_i32, %c0_i32_0 : i32, i32
  }
  func.func @transform_10(%arg0: i32) -> (i32, i32) {
    %c0_i32 = arith.constant 0 : i32
    %c0_i32_0 = arith.constant 0 : i32
    %c0_i32_1 = arith.constant 0 : i32
    return %c0_i32, %c0_i32_0 : i32, i32
  }
  func.func @transform_11(%arg0: i32) -> (i32, i32) {
    %c0_i32 = arith.constant 0 : i32
    %c0_i32_0 = arith.constant 0 : i32
    %c0_i32_1 = arith.constant 0 : i32
    return %c0_i32, %c0_i32_0 : i32, i32
  }
  func.func @transform_12(%arg0: i32) -> (i32, i32) {
    %c0_i32 = arith.constant 0 : i32
    %c0_i32_0 = arith.constant 0 : i32
    %c0_i32_1 = arith.constant 0 : i32
    return %c0_i32, %c0_i32_0 : i32, i32
  }
  func.func @transform_13(%arg0: i32) -> (i32, i32, i32) {
    %c0_i32 = arith.constant 0 : i32
    %c0_i32_0 = arith.constant 0 : i32
    %c0_i32_1 = arith.constant 0 : i32
    return %arg0, %c0_i32, %c0_i32_0 : i32, i32, i32
  }
}

</mosaic_0001>

<bundles_post_ra>
// kernel: tpu_custom_call.1
= control target key start
LH: loop header
LB: loop body
LE: loop exit
PB: predicated region body
PF: predicated region fallthrough
CT: control target
= control target key end

     0   :  { %s2055_s0 = inlined_call_operand.vmem [shape: f32[2,8,32], index: 0, kind: input, shape index: {}]   ;;  %s2056_s1 = inlined_call_operand.vmem [shape: f32[1,32], index: 1, kind: input, shape index: {}]   ;;  %s2057_s2 = inlined_call_operand.vmem [shape: f32[1,32], index: 2, kind: input, shape index: {}]   ;;  %s2058_s3 = inlined_call_operand.vmem [shape: bf16[32,96], index: 3, kind: input, shape index: {}]   ;;  %s2059_s4 = inlined_call_operand.vmem [shape: f32[1,96], index: 4, kind: input, shape index: {}]   ;;  %s2060_s5 = inlined_call_operand.vmem [shape: bf16[32,32], index: 5, kind: input, shape index: {}]   ;;  %s2061_s6 = inlined_call_operand.vmem [shape: f32[1,32], index: 6, kind: input, shape index: {}]   ;;  %s2062_s7 = inlined_call_operand.vmem [shape: f32[1,32], index: 7, kind: input, shape index: {}]   ;;  %s2063_s8 = inlined_call_operand.vmem [shape: f32[1,32], index: 8, kind: input, shape index: {}]   ;;  %s2064_s9 = inlined_call_operand.vmem [shape: bf16[32,128], index: 9, kind: input, shape index: {}]   ;;  %s2065_s10 = inlined_call_operand.vmem [shape: f32[1,128], index: 10, kind: input, shape index: {}]   ;;  %s2066_s11 = inlined_call_operand.vmem [shape: bf16[128,32], index: 11, kind: input, shape index: {}]   ;;  %s2067_s12 = inlined_call_operand.vmem [shape: f32[1,32], index: 12, kind: input, shape index: {}]   ;;  %s2068_s13 = inlined_call_operand.hbm [shape: f32[2,8,32], index: 13, kind: output, shape index: {}]  }
   0x1   :  { %2069 = sst [smem:[#allocation6_spill]] %s2055_s0 }
   0x2   :  { %2070 = sst [smem:[#allocation7_spill]] %s2056_s1 }
   0x3   :  { %2071 = sst [smem:[#allocation8_spill]] %s2057_s2 }
   0x4   :  { %18 = vsyncpa [#allocation4], 0 }
   0x5   :  { %20 = vsyncpa [#allocation4 + $0x1], 0  ;;  %s1787_s25 = smov 0   ;;  %s1789_s26 = smov 0  }
   0x6   :  { %s1791_s27 = smov 0   ;;  %s1793_s28 = smov 0  }
   0x7 LB: > { %s1808_s29 = sadd.s32 4294967295, %s1698_s28   ;;  %s1367_s30 = sadd.s32 4294967294, %s1698_s28   ;;  %s1698_s28 = sphi %s1793_s28, %s2080_s28   ;;  %s1694_s27 = sphi %s1791_s27, %s2079_s27   ;;  %s1690_s26 = sphi %s1789_s26, %s2078_s26   ;;  %s1686_s25 = sphi %s1787_s25, %s2077_s25  }
   0x8   : > { %s1812_s14 = sadd.s32 1, %s1698_s28   ;;  %s311_s15 = sadd.s32 1, %s1694_s27 }
   0x9   : > { %s308_s16 = ssub.s32 %s1698_s28, %s1812_s14  ;;  %p321_p0 = scmp.ne.s32.totalorder %s1694_s27, %s1690_s26 }
   0xa   : > { %p309_p1 = scmp.eq.s32.totalorder %s308_s16, 0  ;;  %p322_p2 = scmp.eq.s32.totalorder %s1808_s29, 1 }
   0xb   : > { %p327_p3 = scmp.ne.s32.totalorder %s1690_s26, %s1686_s25  ;;  %p328_p4 = scmp.eq.s32.totalorder %s1367_s30, 1 }
   0xc   : > { %s1823_s17 = scalar_select %p309_p1, %s1694_s27, %s311_s15  }
   0xd   : > { %p1825_p5 = por %p322_p2, %p321_p0  ;;  %p1829_p6 = por %p328_p4, %p327_p3 }
   0xe   : > { %p1370_p7 = scmp.ge.s32.totalorder %s1698_s28, 1  ;;  %p389_p8 = scmp.lt.s32.totalorder %s1698_s28, 3 }
  0x10   : > { %p390_p9 = pnand %p1370_p7, %p389_p8 }
  0x11   : > { %p432_p10 = scmp.lt.s32.totalorder (!%p390_p9), %s1808_s29, 1  ;;  %vm440_vm0 = vcmask (!%p390_p9), 261120   ;;  %s2074_s0 = sld [smem:[#allocation6_spill]] (!%p390_p9)  ;;  %v1598_v7 = vld [vmem:[%s2058_s3] sm:$0xff] (!%p390_p9)   ;;  %v1700_v8 = vmov (!%p390_p9), 0.0   ;;  %vm1701_vm1 = vmmov (!%p390_p9), 0  }
  0x12   : > { %393 = sbr.rel (%p390_p9) target bundleno = 2463 (0x99f), region = 72  ;;  %1451 = vmatprep.subr.bf16.mxu0 (!%p390_p9), %v1700_v8  ;;  %1455 = vmatprep.mubr.msk.bf16.mxu0 (!%p390_p9), %vm1701_vm1, %v1700_v8  ;;  %v1599_v9 = vld [vmem:[%s2058_s3 + $0x8] sm:$0xff] (!%p390_p9)   ;;  %s2075_s1 = sld [smem:[#allocation7_spill]] (!%p390_p9)  ;;  %v1375_v20 = vld [vmem:[%s2059_s4] ss:$0 sm:$0xff] (!%p390_p9)  ;;  %vm540_vm2 = vcmask (!%p390_p9), 64512  }
  0x13   : > { %1452 = vmatpush3.bf16.msra.mxu0 (!%p390_p9), %v1598_v7  ;;  %1471 = vmatprep.subr.bf16.mxu1 (!%p390_p9), %v1700_v8  ;;  %s2076_s2 = sld [smem:[#allocation8_spill]] (!%p390_p9)  ;;  %s1702_s16 = smov (!%p390_p9), 120   ;;  %vm603_vm3 = vcmask (!%p390_p9), 1043456   ;;  %vm649_vm4 = vcmask (!%p390_p9), 60416   ;;  %vm768_vm5 = vcmask (!%p390_p9), 126016   ;;  %vm887_vm6 = vcmask (!%p390_p9), 191616  }
  0x14   : > { %1453 = vmatprep.subr.bf16.mxu0 (!%p390_p9), %v1700_v8  ;;  %1473 = vmatprep.mubr.msk.bf16.mxu1 (!%p390_p9), %vm1701_vm1, %v1700_v8  ;;  %s1705_s22 = smov (!%p390_p9), 80   ;;  %s1706_s23 = smov (!%p390_p9), 112   ;;  %vm1006_vm7 = vcmask (!%p390_p9), 257216  }
  0x15   : > { %s1708_s30 = smov (!%p390_p9), 104   ;;  %s1709_s15 = smov (!%p390_p9), 64  }
  0x17   : > { %1454 = vmatpush3.bf16.msra.mxu0 (!%p390_p9), %v1599_v9 }
  0x18   : > { %1459 = vmatprep.subr.bf16.mxu0 (!%p390_p9), %v1700_v8  ;;  %v1373_v14 = vld [vmem:[%s2075_s1] ss:$0 sm:$0xff] (!%p390_p9) }
  0x19   : > { %s433_s20 = scalar_select %p432_p10, %s1808_s29, 1  ;;  %v1374_v16 = vld [vmem:[%s2076_s2] ss:$0 sm:$0xff] }
  0x1b   : > { %s1372_s21 = sshll.u32 %s433_s20, 3  ;;  %s1703_s20 = smov 96  }
  0x1c   : > { %s435_s24 = scalar_lea.vmem %s2074_s0, %s1372_s21  ;;  %s1704_s21 = smov 88  }
  0x1d   : > { %v1840_v0 = vld [vmem:[%s435_s24] sm:$0xff]  ;;  %s1707_s24 = smov 72  }
  0x1e   : > { %v441_v1 = vsel %vm440_vm0, %v1840_v0, 0.0 }
  0x1f   : > { %442 = vadd.xlane.f32.xlu0 %v441_v1 }
  0xac   : > { %v443_v2 = vpop.xlane.xlu0 %442 }
  0xad   : > { %v445_v3 = vmul.f32 0.03125, %v443_v2 }
  0xaf   : > { %v446_v4 = vsub.f32 %v1840_v0, %v445_v3 }
  0xb1   : > { %v447_v5 = vmul.f32 %v446_v4, %v446_v4 }
  0xb3   : > { %v448_v6 = vsel %vm440_vm0, %v447_v5, 0.0 }
  0xb4   : > { %449 = vadd.xlane.f32.xlu0 %v448_v6 }
 0x141   : > { %v450_v10 = vpop.xlane.xlu0 %449 }
 0x142   : > { %v451_v11 = vmul.f32 0.03125, %v450_v10 }
 0x144   : > { %v452_v12 = vadd.f32 1e-05, %v451_v11 }
 0x146   : > { %1612 = vrsqrt.f32 %v452_v12 }
 0x150   : > { %v1613_v13 = vpop.eup %1612 }
 0x151   : > { %v454_v15 = vmul.f32 %v1613_v13, %v446_v4 }
 0x153   : > { %v461_v17 = vmul.f32 %v1373_v14, %v454_v15 }
 0x155   : > { %v468_v18 = vadd.f32 %v1374_v16, %v461_v17 }
 0x157   : > { %v469_v19 = vpack.c.bf16 %v468_v18, %v468_v18 }
 0x159   : > { %1456 = vmatmul.mubr.msk.bf16.vlgmr.msra.gmra.mrb[0].mxu0 %vm440_vm0, %v469_v19 }
 0x15a   : > { %1461 = vmatprep.mubr.msk.bf16.mxu0 %vm1701_vm1, %v1700_v8 }
 0x22c   : > { %v530_v21 = vpop.f32.mrb[0].mxu0 }
 0x22d   : > { %v531_v22 = vadd.f32 %v1375_v20, %v530_v21  ;;  %v1457_v23 = vpop.f32.mrb[1].mxu0 }
 0x22e   : > { %v533_v24 = vpop.f32.mrb[2].mxu0 }
 0x22f   : > { %v1872_v25 = vpack.c.bf16 %v531_v22, %v531_v22  ;;  %v1458_v26 = vpop.f32.mrb[3].mxu0 }
 0x231   : > { %651 = vrot.lane.b32.xlu0 %v1872_v25, %s1702_s16  ;;  %538 = vrot.lane.b32.xlu1 %v1872_v25, %s1703_s20  ;;  %s1710_s16 = smov 56   ;;  %s1711_s20 = smov 48  }
 0x235   : > { %653 = vrot.lane.b32.xlu1 %v1872_v25, %s1704_s21  ;;  %s1712_s21 = smov 40  }
 0x239   : > { %772 = vrot.lane.b32.xlu1 %v1872_v25, %s1705_s22  ;;  %s1713_s22 = smov 8  }
 0x23d   : > { %770 = vrot.lane.b32.xlu1 %v1872_v25, %s1706_s23 }
 0x241   : > { %891 = vrot.lane.b32.xlu1 %v1872_v25, %s1707_s24 }
 0x245   : > { %889 = vrot.lane.b32.xlu1 %v1872_v25, %s1708_s30  ;;  %s429_s30 = sand.u32 1, %s1690_s26  }
 0x2a3   : > { %v539_v27 = vpop.permute.xlu1 %538  ;;  %v652_v32 = vpop.permute.xlu0 %651 }
 0x2a4   : > { %v545_v28 = vsel %vm540_vm2, %v539_v27, 0 }
 0x2a5   : > { %1460 = vmatpush3.bf16.xpose.msra.mxu0 %v545_v28 }
 0x2a6   : > { %1465 = vmatprep.subr.bf16.mxu0 %v1700_v8 }
 0x2a7   : > { %v654_v29 = vpop.permute.xlu1 %653 }
 0x2a8   : > { %v659_v30 = vsel %vm540_vm2, %v654_v29, 0 }
 0x2a9   : > { %1472 = vmatpush3.bf16.xpose.msra.mxu1 %v659_v30 }
 0x2aa   : > { %1483 = vmatprep.subr.bf16.mxu1 %v1700_v8 }
 0x2ab   : > { %v773_v31 = vpop.permute.xlu1 %772 }
 0x2ac   : > { %1462 = vmatmul.mubr.msk.bf16.vlgmr.msra.gmra.mrb[4].mxu0 %vm540_vm2, %v1872_v25  ;;  %v778_v34 = vsel %vm540_vm2, %v773_v31, 0 }
 0x2ad   : > { %1467 = vmatprep.mubr.msk.bf16.mxu0 %vm1701_vm1, %v1700_v8 }
 0x2af   : > { %v771_v33 = vpop.permute.xlu1 %770 }
 0x2b0   : > { %1474 = vmatmul.mubr.msk.bf16.vlgmr.msra.gmra.mrb[0].mxu1 %vm540_vm2, %v652_v32 }
 0x2b1   : > { %1484 = vmatpush3.bf16.xpose.msra.mxu1 %v778_v34  ;;  %1485 = vmatprep.mubr.msk.bf16.mxu1 %vm1701_vm1, %v1700_v8 }
 0x2b2   : > { %1495 = vmatprep.subr.bf16.mxu1 %v1700_v8 }
 0x2b3   : > { %v892_v35 = vpop.permute.xlu1 %891 }
 0x2b4   : > { %v897_v36 = vsel %vm540_vm2, %v892_v35, 0 }
 0x2b7   : > { %v890_v37 = vpop.permute.xlu1 %889 }
 0x2b8   : > { %1486 = vmatmul.mubr.msk.bf16.vlgmr.msra.gmra.mrb[4].mxu1 %vm540_vm2, %v771_v33 }
 0x2b9   : > { %1496 = vmatpush3.bf16.xpose.msra.mxu1 %v897_v36  ;;  %1497 = vmatprep.mubr.msk.bf16.mxu1 %vm1701_vm1, %v1700_v8 }
 0x2ba   : > { %1507 = vmatprep.subr.bf16.mxu1 %v1700_v8 }
 0x2c0   : > { %1498 = vmatmul.mubr.msk.bf16.vlgmr.msra.gmra.mrb[8].mxu1 %vm540_vm2, %v890_v37 }
 0x2c1   : > { %1511 = vmatprep.mubr.msk.bf16.mxu1 %vm1701_vm1, %v1700_v8 }
 0x37f   : > { %v581_v38 = vpop.f32.mrb[4].mxu0 }
 0x380   : > { %v1463_v39 = vpop.f32.mrb[5].mxu0  ;;  %v587_v40 = vsel %vm540_vm2, %v581_v38, -inf }
 0x381   : > { %588 = vmax.xlane.f32.xlu1 %v587_v40  ;;  %v584_v41 = vpop.f32.mrb[6].mxu0 }
 0x382   : > { %v1464_v42 = vpop.f32.mrb[7].mxu0 }
 0x383   : > { %v695_v43 = vpop.f32.mrb[0].mxu1 }
 0x384   : > { %v1475_v44 = vpop.f32.mrb[1].mxu1  ;;  %v701_v45 = vsel %vm540_vm2, %v695_v43, -inf }
 0x385   : > { %702 = vmax.xlane.f32.xlu0 %v701_v45  ;;  %v698_v46 = vpop.f32.mrb[2].mxu1 }
 0x386   : > { %v1476_v47 = vpop.f32.mrb[3].mxu1 }
 0x38b   : > { %v814_v48 = vpop.f32.mrb[4].mxu1 }
 0x38c   : > { %v1487_v49 = vpop.f32.mrb[5].mxu1  ;;  %v820_v57 = vsel %vm540_vm2, %v814_v48, -inf }
 0x38d   : > { %v817_v50 = vpop.f32.mrb[6].mxu1 }
 0x38e   : > { %v1488_v51 = vpop.f32.mrb[7].mxu1 }
 0x392   : > { %598 = vrot.lane.b32.xlu1 %v1872_v25, %s1709_s15  ;;  %s1371_s15 = sshll.u32 %s429_s30, 3 }
 0x393   : > { %v933_v52 = vpop.f32.mrb[8].mxu1 }
 0x394   : > { %v1499_v53 = vpop.f32.mrb[9].mxu1  ;;  %v939_v54 = vsel %vm540_vm2, %v933_v52, -inf }
 0x395   : > { %940 = vmax.xlane.f32.xlu0 %v939_v54  ;;  %v936_v55 = vpop.f32.mrb[10].mxu1 }
 0x396   : > { %v1500_v56 = vpop.f32.mrb[11].mxu1 }
 0x3ab   : > { %712 = vrot.lane.b32.xlu0 %v1872_v25, %s1710_s16  ;;  %s1714_s16 = smov 16  }
 0x3b6   : > { %821 = vmax.xlane.f32.xlu1 %v820_v57 }
 0x3c7   : > { %831 = vrot.lane.b32.xlu1 %v1872_v25, %s1711_s20  ;;  %s1715_s20 = smov 24  }
 0x3cb   : > { %950 = vrot.lane.b32.xlu1 %v1872_v25, %s1712_s21  ;;  %s1411_s21 = sshll.u32 %s1808_s29, 7  ;;  %s1295_s29 = scalar_lea.sflag [#allocation4], %s429_s30 }
 0x3cc   : > { %s2012_s1 = scalar_lea.hbm %s2068_s13, %s1411_s21 }
 0x40e   : > { %v589_v58 = vpop.xlane.xlu1 %588 }
 0x40f   : > { %v590_v59 = vsub.f32 %v581_v38, %v589_v58 }
 0x411   : > { %v591_v60 = vmul.f32 1.442695, %v590_v59 }
 0x412   : > { %v703_v61 = vpop.xlane.xlu0 %702  ;;  %v599_v62 = vpop.permute.xlu1 %598 }
 0x413   : > { %1614 = vpow2.f32 %v591_v60  ;;  %v704_v63 = vsub.f32 %v695_v43, %v703_v61  ;;  %v605_v1 = vsel %vm603_vm3, %v599_v62, 0 }
 0x414   : > { %1466 = vmatpush3.bf16.msra.mxu0 %v605_v1 }
 0x415   : > { %v705_v2 = vmul.f32 1.442695, %v704_v63  ;;  %1477 = vmatprep.subr.bf16.mxu0 %v1700_v8 }
 0x417   : > { %1616 = vpow2.f32 %v705_v2 }
 0x41d   : > { %v1615_v3 = vpop.eup %1614 }
 0x41e   : > { %v597_v4 = vpack.c.bf16 %v1615_v3, %v1615_v3  ;;  %v593_v16 = vsel %vm540_vm2, %v1615_v3, 0.0  ;;  %v1390_v3 = vld [vmem:[%s2061_s6] ss:$0 sm:$0xff] }
 0x420   : > { %1468 = vmatmul.mubr.msk.bf16.vlgmr.msra.gmra.mrb[8].mxu0 %vm540_vm2, %v597_v4 }
 0x421   : > { %v1617_v5 = vpop.eup %1616  ;;  %1479 = vmatprep.mubr.msk.bf16.mxu0 %vm1701_vm1, %v1700_v8 }
 0x422   : > { %v941_v6 = vpop.xlane.xlu0 %940  ;;  %v707_v7 = vsel %vm540_vm2, %v1617_v5, 0.0  ;;  %v711_v13 = vpack.c.bf16 %v1617_v5, %v1617_v5 }
 0x423   : > { %v942_v9 = vsub.f32 %v933_v52, %v941_v6  ;;  %708 = vadd.xlane.f32.xlu0 %v707_v7  ;;  %v1601_v52 = vld [vmem:[%s2060_s5 + $0x8] sm:$0xff]  }
 0x425   : > { %v943_v10 = vmul.f32 1.442695, %v942_v9 }
 0x426   : > { %v713_v11 = vpop.permute.xlu0 %712 }
 0x427   : > { %1618 = vpow2.f32 %v943_v10  ;;  %v718_v12 = vsel %vm603_vm3, %v713_v11, 0 }
 0x428   : > { %1478 = vmatpush3.bf16.msra.mxu0 %v718_v12 }
 0x429   : > { %1489 = vmatprep.subr.bf16.mxu0 %v1700_v8 }
 0x42b   : > { %1480 = vmatmul.mubr.msk.bf16.vlgmr.msra.gmra.mrb[12].mxu0 %vm540_vm2, %v711_v13 }
 0x42c   : > { %1491 = vmatprep.mubr.msk.bf16.mxu0 %vm1701_vm1, %v1700_v8 }
 0x431   : > { %v1619_v14 = vpop.eup %1618 }
 0x432   : > { %v945_v15 = vsel %vm540_vm2, %v1619_v14, 0.0  ;;  %v949_v27 = vpack.c.bf16 %v1619_v14, %v1619_v14 }
 0x433   : > { %946 = vadd.xlane.f32.xlu0 %v945_v15 }
 0x437   : > { %594 = vadd.xlane.f32.xlu0 %v593_v16 }
 0x443   : > { %v822_v17 = vpop.xlane.xlu1 %821 }
 0x444   : > { %v823_v18 = vsub.f32 %v814_v48, %v822_v17  ;;  %v1600_v48 = vld [vmem:[%s2060_s5] sm:$0xff]  }
 0x445   : > { %1508 = vmatpush3.bf16.msra.mxu1 %v1600_v48  ;;  %v1602_v17 = vld [vmem:[%s2064_s9] sm:$0xff]  }
 0x446   : > { %v824_v19 = vmul.f32 1.442695, %v823_v18  ;;  %1509 = vmatprep.subr.bf16.mxu1 %v1700_v8  ;;  %v1401_v48 = vld [vmem:[%s2067_s12] ss:$0 sm:$0xff] }
 0x447   : > { %v832_v20 = vpop.permute.xlu1 %831 }
 0x448   : > { %1620 = vpow2.f32 %v824_v19  ;;  %v837_v21 = vsel %vm603_vm3, %v832_v20, 0 }
 0x449   : > { %1490 = vmatpush3.bf16.msra.mxu0 %v837_v21  ;;  %1510 = vmatpush3.bf16.msra.mxu1 %v1601_v52 }
 0x44a   : > { %1501 = vmatprep.subr.bf16.mxu0 %v1700_v8  ;;  %1523 = vmatprep.subr.bf16.mxu1 %v1700_v8 }
 0x44b   : > { %v951_v23 = vpop.permute.xlu1 %950 }
 0x44c   : > { %v956_v26 = vsel %vm603_vm3, %v951_v23, 0 }
 0x452   : > { %v1621_v22 = vpop.eup %1620 }
 0x453   : > { %v826_v24 = vsel %vm540_vm2, %v1621_v22, 0.0  ;;  %v830_v25 = vpack.c.bf16 %v1621_v22, %v1621_v22  ;;  %v1394_v22 = vld [vmem:[%s2062_s7] ss:$0 sm:$0xff] }
 0x454   : > { %827 = vadd.xlane.f32.xlu1 %v826_v24  ;;  %v1395_v24 = vld [vmem:[%s2063_s8] ss:$0 sm:$0xff] }
 0x455   : > { %1492 = vmatmul.mubr.msk.bf16.vlgmr.msra.gmra.mrb[16].mxu0 %vm540_vm2, %v830_v25 }
 0x456   : > { %1502 = vmatpush3.bf16.msra.mxu0 %v956_v26  ;;  %1503 = vmatprep.mubr.msk.bf16.mxu0 %vm1701_vm1, %v1700_v8 }
 0x457   : > { %1515 = vmatprep.subr.bf16.mxu0 %v1700_v8 }
 0x45d   : > { %1504 = vmatmul.mubr.msk.bf16.vlgmr.msra.gmra.mrb[20].mxu0 %vm540_vm2, %v949_v27 }
 0x45e   : > { %1519 = vmatprep.mubr.msk.bf16.mxu0 %vm1701_vm1, %v1700_v8  ;;  %1516 = vmatpush3.bf16.msra.mxu0 %v1602_v17 }
 0x45f   : > { %1517 = vmatprep.subr.bf16.mxu0 %v1700_v8 }
 0x4b0   : > { %v709_v28 = vpop.xlane.xlu0 %708 }
 0x4c0   : > { %v947_v29 = vpop.xlane.xlu0 %946 }
 0x4c4   : > { %v595_v30 = vpop.xlane.xlu0 %594 }
 0x4c5   : > { %1622 = vrcp.f32 %v595_v30  ;;  %v1606_v30 = vld [vmem:[%s2066_s11 + $0x10] sm:$0xff]  }
 0x4c6   : > { %1624 = vrcp.f32 %v709_v28  ;;  %v1604_v28 = vld [vmem:[%s2066_s11] sm:$0xff]  }
 0x4cf   : > { %v1623_v31 = vpop.eup %1622 }
 0x4d0   : > { %v1625_v38 = vpop.eup %1624 }
 0x4e1   : > { %v828_v45 = vpop.xlane.xlu1 %827 }
 0x4e2   : > { %1626 = vrcp.f32 %v828_v45 }
 0x4e3   : > { %1628 = vrcp.f32 %v947_v29  ;;  %v1605_v29 = vld [vmem:[%s2066_s11 + $0x8] sm:$0xff]  }
 0x4ec   : > { %v1627_v46 = vpop.eup %1626 }
 0x4ed   : > { %v1629_v55 = vpop.eup %1628 }
 0x4f3   : > { %v641_v32 = vpop.f32.mrb[8].mxu0 }
 0x4f4   : > { %v647_v33 = vmul.f32 %v1623_v31, %v641_v32  ;;  %v1469_v34 = vpop.f32.mrb[9].mxu0  ;;  %v1607_v31 = vld [vmem:[%s2066_s11 + $0x18] sm:$0xff]   ;;  %v1608_v32 = vld [vmem:[%s2066_s11 + $0x20] sm:$0xff]  }
 0x4f5   : > { %v644_v35 = vpop.f32.mrb[10].mxu0  ;;  %v1610_v34 = vld [vmem:[%s2066_s11 + $0x30] sm:$0xff]  }
 0x4f6   : > { %v648_v36 = vpack.c.bf16 %v647_v33, %v647_v33  ;;  %v1470_v37 = vpop.f32.mrb[11].mxu0  ;;  %v1609_v33 = vld [vmem:[%s2066_s11 + $0x28] sm:$0xff]   ;;  %v1611_v35 = vld [vmem:[%s2066_s11 + $0x38] sm:$0xff]  }
 0x4f8   : > { %650 = vst.msk [vmem:[#allocation2] sm:$0xf] %vm649_vm4, %v648_v36  ;;  %v1396_v36 = vld [vmem:[%s2065_s10] ss:$0 sm:$0xff] }
 0x4fe   : > { %v754_v39 = vpop.f32.mrb[12].mxu0 }
 0x4ff   : > { %v760_v40 = vmul.f32 %v1625_v38, %v754_v39  ;;  %v1481_v41 = vpop.f32.mrb[13].mxu0 }
 0x500   : > { %v757_v42 = vpop.f32.mrb[14].mxu0 }
 0x501   : > { %v1414_v43 = vpack.c.bf16 %v760_v40, %v760_v40  ;;  %v1482_v44 = vpop.f32.mrb[15].mxu0 }
 0x503   : > { %765 = vrot.lane.b32.xlu1 %v1414_v43, %s1713_s22  ;;  %s431_s22 = scalar_lea.vmem [#allocation3], %s1371_s15 }
 0x504   : > { %s1308_s23 = sshll.u32 %s431_s22, 4  ;;  %s2014_s23 = int_to_ptr.vmem [resolvable:$true] %s1308_s23 }
 0x505   : > { %s1636_s15 = scalar_lea.vmem %s2014_s23, 128 }
 0x506   : > { %p1637_p11 = scmp.ne.s32.totalorder %s2014_s23, %s1636_s15 }
 0x508   : > { %p1638_p12 = pnand %p1637_p11, %p1825_p5 }
 0x50a   : > { %p1639_p13 = pneg %p1638_p12 }
 0x528   : > { %v873_v47 = vpop.f32.mrb[16].mxu0 }
 0x529   : > { %v879_v49 = vmul.f32 %v1627_v46, %v873_v47  ;;  %v1493_v50 = vpop.f32.mrb[17].mxu0 }
 0x52a   : > { %v876_v51 = vpop.f32.mrb[18].mxu0 }
 0x52b   : > { %v1415_v53 = vpack.c.bf16 %v879_v49, %v879_v49  ;;  %v1494_v54 = vpop.f32.mrb[19].mxu0 }
 0x52d   : > { %884 = vrot.lane.b32.xlu0 %v1415_v53, %s1714_s16  ;;  %s1716_s16 = smov [#allocation3]  }
 0x530   : > { %v992_v56 = vpop.f32.mrb[20].mxu0 }
 0x531   : > { %v998_v57 = vmul.f32 %v1629_v55, %v992_v56  ;;  %v1505_v58 = vpop.f32.mrb[21].mxu0 }
 0x532   : > { %v995_v59 = vpop.f32.mrb[22].mxu0 }
 0x533   : > { %v1416_v60 = vpack.c.bf16 %v998_v57, %v998_v57  ;;  %v1506_v61 = vpop.f32.mrb[23].mxu0 }
 0x535   : > { %1003 = vrot.lane.b32.xlu1 %v1416_v60, %s1715_s20  ;;  %s1640_s20 = sshll.u32 %s1716_s16, 4  ;;  %s1641_s20 = int_to_ptr.vmem [resolvable:$false] %s1640_s20 }
 0x536   : > { %s1642_s2 = scalar_lea.vmem %s1641_s20, 256  ;;  %p1643_p0 = scmp.lt.s32.totalorder %s2014_s23, %s1641_s20 }
 0x537   : > { %p1644_p1 = scmp.lt.s32.totalorder %s1642_s2, %s1636_s15 }
 0x539   : > { %p1645_p2 = por %p1644_p1, %p1643_p0 }
 0x53b   : > { %p1646_p3 = pnand %p1645_p2, %p1639_p13 }
 0x575   : > { %v766_v62 = vpop.permute.xlu1 %765 }
 0x576   : > { %769 = vst.msk [vmem:[#allocation2] sm:$0xf] %vm768_vm5, %v766_v62 }
 0x59f   : > { %v885_v63 = vpop.permute.xlu0 %884 }
 0x5a0   : > { %888 = vst.msk [vmem:[#allocation2] sm:$0xf] %vm887_vm6, %v885_v63 }
 0x5a7   : > { %v1004_v1 = vpop.permute.xlu1 %1003 }
 0x5a8   : > { %1007 = vst.msk [vmem:[#allocation2] sm:$0xf] %vm1006_vm7, %v1004_v1 }
 0x5af   : > { %v1008_v2 = vld [vmem:[#allocation2] sm:$0xf] }
 0x5b0   : > { %1512 = vmatmul.mubr.msk.bf16.vlgmr.msra.gmra.mrb[12].mxu1 %vm440_vm0, %v1008_v2 }
 0x5b1   : > { %1539 = vmatprep.mubr.msk.bf16.mxu1 %vm1701_vm1, %v1700_v8  ;;  %1524 = vmatpush3.bf16.msra.mxu1 %v1604_v28 }
 0x5b2   : > { %1525 = vmatprep.subr.bf16.mxu1 %v1700_v8 }
 0x5b5   : > { %1526 = vmatpush3.bf16.msra.mxu1 %v1605_v29 }
 0x5b6   : > { %1527 = vmatprep.subr.bf16.mxu1 %v1700_v8 }
 0x5b9   : > { %1528 = vmatpush3.bf16.msra.mxu1 %v1606_v30 }
 0x5ba   : > { %1529 = vmatprep.subr.bf16.mxu1 %v1700_v8 }
 0x5bd   : > { %1530 = vmatpush3.bf16.msra.mxu1 %v1607_v31 }
 0x5be   : > { %1531 = vmatprep.subr.bf16.mxu1 %v1700_v8 }
 0x5c1   : > { %1532 = vmatpush3.bf16.msra.mxu1 %v1608_v32 }
 0x5c2   : > { %1533 = vmatprep.subr.bf16.mxu1 %v1700_v8 }
 0x5c5   : > { %1534 = vmatpush3.bf16.msra.mxu1 %v1609_v33 }
 0x5c6   : > { %1535 = vmatprep.subr.bf16.mxu1 %v1700_v8 }
 0x5c9   : > { %1536 = vmatpush3.bf16.msra.mxu1 %v1610_v34 }
 0x5ca   : > { %1537 = vmatprep.subr.bf16.mxu1 %v1700_v8 }
 0x5cd   : > { %1538 = vmatpush3.bf16.msra.mxu1 %v1611_v35 }
 0x683   : > { %v1069_v4 = vpop.f32.mrb[12].mxu1 }
 0x684   : > { %v1070_v5 = vadd.f32 %v1390_v3, %v1069_v4  ;;  %v1513_v6 = vpop.f32.mrb[13].mxu1 }
 0x685   : > { %v1072_v7 = vpop.f32.mrb[14].mxu1 }
 0x686   : > { %v1949_v9 = vadd.f32 %v1070_v5, %v1840_v0  ;;  %v1514_v10 = vpop.f32.mrb[15].mxu1  ;;  %v1603_v0 = vld [vmem:[%s2064_s9 + $0x8] sm:$0xff]  }
 0x687   : > { %1518 = vmatpush3.bf16.msra.mxu0 %v1603_v0 }
 0x688   : > { %v1078_v11 = vsel %vm440_vm0, %v1949_v9, 0.0 }
 0x689   : > { %1079 = vadd.xlane.f32.xlu1 %v1078_v11 }
 0x716   : > { %v1080_v12 = vpop.xlane.xlu1 %1079 }
 0x717   : > { %v1081_v13 = vmul.f32 0.03125, %v1080_v12 }
 0x719   : > { %v1082_v14 = vsub.f32 %v1949_v9, %v1081_v13 }
 0x71b   : > { %v1083_v15 = vmul.f32 %v1082_v14, %v1082_v14 }
 0x71d   : > { %v1084_v16 = vsel %vm440_vm0, %v1083_v15, 0.0 }
 0x71e   : > { %1085 = vadd.xlane.f32.xlu0 %v1084_v16 }
 0x7ab   : > { %v1086_v18 = vpop.xlane.xlu0 %1085 }
 0x7ac   : > { %v1087_v19 = vmul.f32 0.03125, %v1086_v18 }
 0x7ae   : > { %v1088_v20 = vadd.f32 1e-05, %v1087_v19 }
 0x7b0   : > { %1630 = vrsqrt.f32 %v1088_v20 }
 0x7ba   : > { %v1631_v21 = vpop.eup %1630 }
 0x7bb   : > { %v1090_v23 = vmul.f32 %v1631_v21, %v1082_v14 }
 0x7bd   : > { %v1097_v25 = vmul.f32 %v1394_v22, %v1090_v23 }
 0x7bf   : > { %v1104_v26 = vadd.f32 %v1395_v24, %v1097_v25 }
 0x7c1   : > { %v1105_v27 = vpack.c.bf16 %v1104_v26, %v1104_v26 }
 0x7c3   : > { %1520 = vmatmul.mubr.msk.bf16.vlgmr.msra.gmra.mrb[24].mxu0 %vm440_vm0, %v1105_v27 }
 0x896   : > { %v1166_v37 = vpop.f32.mrb[24].mxu0 }
 0x897   : > { %v1167_v38 = vadd.f32 %v1396_v36, %v1166_v37  ;;  %v1521_v39 = vpop.f32.mrb[25].mxu0 }
 0x898   : > { %v1169_v40 = vpop.f32.mrb[26].mxu0 }
 0x899   : > { %v1400_v41 = vmul.f32 -1.702, %v1167_v38  ;;  %v1522_v42 = vpop.f32.mrb[27].mxu0 }
 0x89b   : > { %v1174_v43 = vmul.f32 1.442695, %v1400_v41 }
 0x89d   : > { %1632 = vpow2.f32 %v1174_v43 }
 0x8a7   : > { %v1633_v8 = vpop.eup %1632 }
 0x8a8   : > { %v1176_v44 = vadd.f32 1.0, %v1633_v8 }
 0x8aa   : > { %1634 = vrcp.f32 %v1176_v44 }
 0x8b4   : > { %v1635_v45 = vpop.eup %1634 }
 0x8b5   : > { %v1179_v46 = vmul.f32 %v1635_v45, %v1167_v38 }
 0x8b7   : > { %v1180_v47 = vpack.c.bf16 %v1179_v46, %v1179_v46 }
 0x8b9   : > { %1540 = vmatmul.mubr.bf16.vlgmr.msra.gmra.mrb[16].mxu1 %v1180_v47 }
 0x98c   : > { %v1286_v49 = vpop.f32.mrb[16].mxu1 }
 0x98d   : > { %v1287_v50 = vadd.f32 %v1401_v48, %v1286_v49  ;;  %v1541_v51 = vpop.f32.mrb[17].mxu1 }
 0x98e   : > { %v1289_v52 = vpop.f32.mrb[18].mxu1 }
 0x98f   : > { %v1292_v53 = vadd.f32 %v1287_v50, %v1949_v9  ;;  %v1542_v54 = vpop.f32.mrb[19].mxu1 }
 0x991   : > { %1293 = vst.msk [vmem:[%s431_s22] sm:$0xff] %vm440_vm0, %v1292_v53 }
 0x992   : > { %1649 = shalt.err (!%p1646_p3)
}
 0x993   : > { %s1650_s0 = scalar_lea.hbm %s2012_s1, 128  ;;  %s1654_s22 = scalar_lea.hbm %s2068_s13, 256 }
 0x994   : > { %p1651_p4 = scmp.ne.s32.totalorder %s2012_s1, %s1650_s0  ;;  %p1655_p9 = scmp.lt.u32.totalorder %s2012_s1, %s2068_s13 }
 0x995   : > { %p1656_p10 = scmp.lt.u32.totalorder %s1654_s22, %s1650_s0  ;;  %p1658_p12 = scmp.lt.u32.totalorder %s1650_s0, %s2012_s1 }
 0x996   : > { %p1652_p7 = pnand %p1651_p4, %p1825_p5 }
 0x997   : > { %p1657_p11 = por %p1656_p10, %p1655_p9 }
 0x998   : > { %p1653_p8 = pneg %p1652_p7 }
 0x999   : > { %p1659_p13 = por %p1658_p12, %p1657_p11 }
 0x99b   : > { %p1660_p0 = pnand %p1659_p13, %p1653_p8 }
 0x99d   : > { %1663 = shalt.err (!%p1660_p0)
}
 0x99e   : > { %1543 = dma.vmem_to_hbm [thread:$0]  (%p1825_p5), %s2014_s23, 128, %s2012_s1, %s1295_s29  }
 0x99f PF: > { %p1549_p1 = scmp.ge.s32.totalorder %s1698_s28, 2  ;;  %s1320_s2 = sand.u32 1, %s1686_s25  }
 0x9a0   : > { %s1321_s15 = scalar_lea.sflag [#allocation4], %s1320_s2 }
 0x9a1   : > { %p1546_p2 = pnand %p1549_p1, %p1829_p6 }
 0x9a3   : > { %1681 = dma.done.wait (!%p1546_p2), %s1321_s15, 128  }
 0x9a4   : > { %1683 = vsyncadd (!%p1546_p2), %s1321_s15, 4294967168  ;;  %p23_p3 = scmp.ge.s32.totalorder %s1812_s14, 4   ;;  %s2077_s25 = smov %s1690_s26 }
 0x9a5   : > { %s2078_s26 = smov %s1694_s27  ;;  %s2079_s27 = smov %s1823_s17 }
 0x9a6   : > { %s2080_s28 = smov %s1812_s14  ;;  %25 = sbr.rel (!%p23_p3) target bundleno = 7 (0x7), region = 107 }
 0x9ad   :  { %1326 = vsyncpa [#allocation4], 1 }
 0x9ae   :  { %1328 = vsyncpa [#allocation4 + $0x1], 1 }

// kernel: tpu_custom_call.1
= control target key start
LH: loop header
LB: loop body
LE: loop exit
PB: predicated region body
PF: predicated region fallthrough
CT: control target
= control target key end

     0   :  { %s2055_s0 = inlined_call_operand.vmem [shape: f32[2,8,32], index: 0, kind: input, shape index: {}]   ;;  %s2056_s1 = inlined_call_operand.vmem [shape: f32[1,32], index: 1, kind: input, shape index: {}]   ;;  %s2057_s2 = inlined_call_operand.vmem [shape: f32[1,32], index: 2, kind: input, shape index: {}]   ;;  %s2058_s3 = inlined_call_operand.vmem [shape: bf16[32,96], index: 3, kind: input, shape index: {}]   ;;  %s2059_s4 = inlined_call_operand.vmem [shape: f32[1,96], index: 4, kind: input, shape index: {}]   ;;  %s2060_s5 = inlined_call_operand.vmem [shape: bf16[32,32], index: 5, kind: input, shape index: {}]   ;;  %s2061_s6 = inlined_call_operand.vmem [shape: f32[1,32], index: 6, kind: input, shape index: {}]   ;;  %s2062_s7 = inlined_call_operand.vmem [shape: f32[1,32], index: 7, kind: input, shape index: {}]   ;;  %s2063_s8 = inlined_call_operand.vmem [shape: f32[1,32], index: 8, kind: input, shape index: {}]   ;;  %s2064_s9 = inlined_call_operand.vmem [shape: bf16[32,128], index: 9, kind: input, shape index: {}]   ;;  %s2065_s10 = inlined_call_operand.vmem [shape: f32[1,128], index: 10, kind: input, shape index: {}]   ;;  %s2066_s11 = inlined_call_operand.vmem [shape: bf16[128,32], index: 11, kind: input, shape index: {}]   ;;  %s2067_s12 = inlined_call_operand.vmem [shape: f32[1,32], index: 12, kind: input, shape index: {}]   ;;  %s2068_s13 = inlined_call_operand.hbm [shape: f32[2,8,32], index: 13, kind: output, shape index: {}]  }
   0x1   :  { %2069 = sst [smem:[#allocation6_spill]] %s2055_s0 }
   0x2   :  { %2070 = sst [smem:[#allocation7_spill]] %s2056_s1 }
   0x3   :  { %2071 = sst [smem:[#allocation8_spill]] %s2057_s2 }
   0x4   :  { %18 = vsyncpa [#allocation4], 0 }
   0x5   :  { %20 = vsyncpa [#allocation4 + $0x1], 0  ;;  %s1787_s25 = smov 0   ;;  %s1789_s26 = smov 0  }
   0x6   :  { %s1791_s27 = smov 0   ;;  %s1793_s28 = smov 0  }
   0x7 LB: > { %s1808_s29 = sadd.s32 4294967295, %s1698_s28   ;;  %s1367_s30 = sadd.s32 4294967294, %s1698_s28   ;;  %s1698_s28 = sphi %s1793_s28, %s2080_s28   ;;  %s1694_s27 = sphi %s1791_s27, %s2079_s27   ;;  %s1690_s26 = sphi %s1789_s26, %s2078_s26   ;;  %s1686_s25 = sphi %s1787_s25, %s2077_s25  }
   0x8   : > { %s1812_s14 = sadd.s32 1, %s1698_s28   ;;  %s311_s15 = sadd.s32 1, %s1694_s27 }
   0x9   : > { %s308_s16 = ssub.s32 %s1698_s28, %s1812_s14  ;;  %p321_p0 = scmp.ne.s32.totalorder %s1694_s27, %s1690_s26 }
   0xa   : > { %p309_p1 = scmp.eq.s32.totalorder %s308_s16, 0  ;;  %p322_p2 = scmp.eq.s32.totalorder %s1808_s29, 1 }
   0xb   : > { %p327_p3 = scmp.ne.s32.totalorder %s1690_s26, %s1686_s25  ;;  %p328_p4 = scmp.eq.s32.totalorder %s1367_s30, 1 }
   0xc   : > { %s1823_s17 = scalar_select %p309_p1, %s1694_s27, %s311_s15  }
   0xd   : > { %p1825_p5 = por %p322_p2, %p321_p0  ;;  %p1829_p6 = por %p328_p4, %p327_p3 }
   0xe   : > { %p1370_p7 = scmp.ge.s32.totalorder %s1698_s28, 1  ;;  %p389_p8 = scmp.lt.s32.totalorder %s1698_s28, 3 }
  0x10   : > { %p390_p9 = pnand %p1370_p7, %p389_p8 }
  0x11   : > { %p432_p10 = scmp.lt.s32.totalorder (!%p390_p9), %s1808_s29, 1  ;;  %vm440_vm0 = vcmask (!%p390_p9), 261120   ;;  %s2074_s0 = sld [smem:[#allocation6_spill]] (!%p390_p9)  ;;  %v1598_v7 = vld [vmem:[%s2058_s3] sm:$0xff] (!%p390_p9)   ;;  %v1700_v8 = vmov (!%p390_p9), 0.0   ;;  %vm1701_vm1 = vmmov (!%p390_p9), 0  }
  0x12   : > { %393 = sbr.rel (%p390_p9) target bundleno = 2463 (0x99f), region = 72  ;;  %1451 = vmatprep.subr.bf16.mxu0 (!%p390_p9), %v1700_v8  ;;  %1455 = vmatprep.mubr.msk.bf16.mxu0 (!%p390_p9), %vm1701_vm1, %v1700_v8  ;;  %v1599_v9 = vld [vmem:[%s2058_s3 + $0x8] sm:$0xff] (!%p390_p9)   ;;  %s2075_s1 = sld [smem:[#allocation7_spill]] (!%p390_p9)  ;;  %v1375_v20 = vld [vmem:[%s2059_s4] ss:$0 sm:$0xff] (!%p390_p9)  ;;  %vm540_vm2 = vcmask (!%p390_p9), 64512  }
  0x13   : > { %1452 = vmatpush3.bf16.msra.mxu0 (!%p390_p9), %v1598_v7  ;;  %1471 = vmatprep.subr.bf16.mxu1 (!%p390_p9), %v1700_v8  ;;  %s2076_s2 = sld [smem:[#allocation8_spill]] (!%p390_p9)  ;;  %s1702_s16 = smov (!%p390_p9), 120   ;;  %vm603_vm3 = vcmask (!%p390_p9), 1043456   ;;  %vm649_vm4 = vcmask (!%p390_p9), 60416   ;;  %vm768_vm5 = vcmask (!%p390_p9), 126016   ;;  %vm887_vm6 = vcmask (!%p390_p9), 191616  }
  0x14   : > { %1453 = vmatprep.subr.bf16.mxu0 (!%p390_p9), %v1700_v8  ;;  %1473 = vmatprep.mubr.msk.bf16.mxu1 (!%p390_p9), %vm1701_vm1, %v1700_v8  ;;  %s1705_s22 = smov (!%p390_p9), 80   ;;  %s1706_s23 = smov (!%p390_p9), 112   ;;  %vm1006_vm7 = vcmask (!%p390_p9), 257216  }
  0x15   : > { %s1708_s30 = smov (!%p390_p9), 104   ;;  %s1709_s15 = smov (!%p390_p9), 64  }
  0x17   : > { %1454 = vmatpush3.bf16.msra.mxu0 (!%p390_p9), %v1599_v9 }
  0x18   : > { %1459 = vmatprep.subr.bf16.mxu0 (!%p390_p9), %v1700_v8  ;;  %v1373_v14 = vld [vmem:[%s2075_s1] ss:$0 sm:$0xff] (!%p390_p9) }
  0x19   : > { %s433_s20 = scalar_select %p432_p10, %s1808_s29, 1  ;;  %v1374_v16 = vld [vmem:[%s2076_s2] ss:$0 sm:$0xff] }
  0x1b   : > { %s1372_s21 = sshll.u32 %s433_s20, 3  ;;  %s1703_s20 = smov 96  }
  0x1c   : > { %s435_s24 = scalar_lea.vmem %s2074_s0, %s1372_s21  ;;  %s1704_s21 = smov 88  }
  0x1d   : > { %v1840_v0 = vld [vmem:[%s435_s24] sm:$0xff]  ;;  %s1707_s24 = smov 72  }
  0x1e   : > { %v441_v1 = vsel %vm440_vm0, %v1840_v0, 0.0 }
  0x1f   : > { %442 = vadd.xlane.f32.xlu0 %v441_v1 }
  0xac   : > { %v443_v2 = vpop.xlane.xlu0 %442 }
  0xad   : > { %v445_v3 = vmul.f32 0.03125, %v443_v2 }
  0xaf   : > { %v446_v4 = vsub.f32 %v1840_v0, %v445_v3 }
  0xb1   : > { %v447_v5 = vmul.f32 %v446_v4, %v446_v4 }
  0xb3   : > { %v448_v6 = vsel %vm440_vm0, %v447_v5, 0.0 }
  0xb4   : > { %449 = vadd.xlane.f32.xlu0 %v448_v6 }
 0x141   : > { %v450_v10 = vpop.xlane.xlu0 %449 }
 0x142   : > { %v451_v11 = vmul.f32 0.03125, %v450_v10 }
 0x144   : > { %v452_v12 = vadd.f32 1e-05, %v451_v11 }
 0x146   : > { %1612 = vrsqrt.f32 %v452_v12 }
 0x150   : > { %v1613_v13 = vpop.eup %1612 }
 0x151   : > { %v454_v15 = vmul.f32 %v1613_v13, %v446_v4 }
 0x153   : > { %v461_v17 = vmul.f32 %v1373_v14, %v454_v15 }
 0x155   : > { %v468_v18 = vadd.f32 %v1374_v16, %v461_v17 }
 0x157   : > { %v469_v19 = vpack.c.bf16 %v468_v18, %v468_v18 }
 0x159   : > { %1456 = vmatmul.mubr.msk.bf16.vlgmr.msra.gmra.mrb[0].mxu0 %vm440_vm0, %v469_v19 }
 0x15a   : > { %1461 = vmatprep.mubr.msk.bf16.mxu0 %vm1701_vm1, %v1700_v8 }
 0x22c   : > { %v530_v21 = vpop.f32.mrb[0].mxu0 }
 0x22d   : > { %v531_v22 = vadd.f32 %v1375_v20, %v530_v21  ;;  %v1457_v23 = vpop.f32.mrb[1].mxu0 }
 0x22e   : > { %v533_v24 = vpop.f32.mrb[2].mxu0 }
 0x22f   : > { %v1872_v25 = vpack.c.bf16 %v531_v22, %v531_v22  ;;  %v1458_v26 = vpop.f32.mrb[3].mxu0 }
 0x231   : > { %651 = vrot.lane.b32.xlu0 %v1872_v25, %s1702_s16  ;;  %538 = vrot.lane.b32.xlu1 %v1872_v25, %s1703_s20  ;;  %s1710_s16 = smov 56   ;;  %s1711_s20 = smov 48  }
 0x235   : > { %653 = vrot.lane.b32.xlu1 %v1872_v25, %s1704_s21  ;;  %s1712_s21 = smov 40  }
 0x239   : > { %772 = vrot.lane.b32.xlu1 %v1872_v25, %s1705_s22  ;;  %s1713_s22 = smov 8  }
 0x23d   : > { %770 = vrot.lane.b32.xlu1 %v1872_v25, %s1706_s23 }
 0x241   : > { %891 = vrot.lane.b32.xlu1 %v1872_v25, %s1707_s24 }
 0x245   : > { %889 = vrot.lane.b32.xlu1 %v1872_v25, %s1708_s30  ;;  %s429_s30 = sand.u32 1, %s1690_s26  }
 0x2a3   : > { %v539_v27 = vpop.permute.xlu1 %538  ;;  %v652_v32 = vpop.permute.xlu0 %651 }
 0x2a4   : > { %v545_v28 = vsel %vm540_vm2, %v539_v27, 0 }
 0x2a5   : > { %1460 = vmatpush3.bf16.xpose.msra.mxu0 %v545_v28 }
 0x2a6   : > { %1465 = vmatprep.subr.bf16.mxu0 %v1700_v8 }
 0x2a7   : > { %v654_v29 = vpop.permute.xlu1 %653 }
 0x2a8   : > { %v659_v30 = vsel %vm540_vm2, %v654_v29, 0 }
 0x2a9   : > { %1472 = vmatpush3.bf16.xpose.msra.mxu1 %v659_v30 }
 0x2aa   : > { %1483 = vmatprep.subr.bf16.mxu1 %v1700_v8 }
 0x2ab   : > { %v773_v31 = vpop.permute.xlu1 %772 }
 0x2ac   : > { %1462 = vmatmul.mubr.msk.bf16.vlgmr.msra.gmra.mrb[4].mxu0 %vm540_vm2, %v1872_v25  ;;  %v778_v34 = vsel %vm540_vm2, %v773_v31, 0 }
 0x2ad   : > { %1467 = vmatprep.mubr.msk.bf16.mxu0 %vm1701_vm1, %v1700_v8 }
 0x2af   : > { %v771_v33 = vpop.permute.xlu1 %770 }
 0x2b0   : > { %1474 = vmatmul.mubr.msk.bf16.vlgmr.msra.gmra.mrb[0].mxu1 %vm540_vm2, %v652_v32 }
 0x2b1   : > { %1484 = vmatpush3.bf16.xpose.msra.mxu1 %v778_v34  ;;  %1485 = vmatprep.mubr.msk.bf16.mxu1 %vm1701_vm1, %v1700_v8 }
 0x2b2   : > { %1495 = vmatprep.subr.bf16.mxu1 %v1700_v8 }
 0x2b3   : > { %v892_v35 = vpop.permute.xlu1 %891 }
 0x2b4   : > { %v897_v36 = vsel %vm540_vm2, %v892_v35, 0 }
 0x2b7   : > { %v890_v37 = vpop.permute.xlu1 %889 }
 0x2b8   : > { %1486 = vmatmul.mubr.msk.bf16.vlgmr.msra.gmra.mrb[4].mxu1 %vm540_vm2, %v771_v33 }
 0x2b9   : > { %1496 = vmatpush3.bf16.xpose.msra.mxu1 %v897_v36  ;;  %1497 = vmatprep.mubr.msk.bf16.mxu1 %vm1701_vm1, %v1700_v8 }
 0x2ba   : > { %1507 = vmatprep.subr.bf16.mxu1 %v1700_v8 }
 0x2c0   : > { %1498 = vmatmul.mubr.msk.bf16.vlgmr.msra.gmra.mrb[8].mxu1 %vm540_vm2, %v890_v37 }
 0x2c1   : > { %1511 = vmatprep.mubr.msk.bf16.mxu1 %vm1701_vm1, %v1700_v8 }
 0x37f   : > { %v581_v38 = vpop.f32.mrb[4].mxu0 }
 0x380   : > { %v1463_v39 = vpop.f32.mrb[5].mxu0  ;;  %v587_v40 = vsel %vm540_vm2, %v581_v38, -inf }
 0x381   : > { %588 = vmax.xlane.f32.xlu1 %v587_v40  ;;  %v584_v41 = vpop.f32.mrb[6].mxu0 }
 0x382   : > { %v1464_v42 = vpop.f32.mrb[7].mxu0 }
 0x383   : > { %v695_v43 = vpop.f32.mrb[0].mxu1 }
 0x384   : > { %v1475_v44 = vpop.f32.mrb[1].mxu1  ;;  %v701_v45 = vsel %vm540_vm2, %v695_v43, -inf }
 0x385   : > { %702 = vmax.xlane.f32.xlu0 %v701_v45  ;;  %v698_v46 = vpop.f32.mrb[2].mxu1 }
 0x386   : > { %v1476_v47 = vpop.f32.mrb[3].mxu1 }
 0x38b   : > { %v814_v48 = vpop.f32.mrb[4].mxu1 }
 0x38c   : > { %v1487_v49 = vpop.f32.mrb[5].mxu1  ;;  %v820_v57 = vsel %vm540_vm2, %v814_v48, -inf }
 0x38d   : > { %v817_v50 = vpop.f32.mrb[6].mxu1 }
 0x38e   : > { %v1488_v51 = vpop.f32.mrb[7].mxu1 }
 0x392   : > { %598 = vrot.lane.b32.xlu1 %v1872_v25, %s1709_s15  ;;  %s1371_s15 = sshll.u32 %s429_s30, 3 }
 0x393   : > { %v933_v52 = vpop.f32.mrb[8].mxu1 }
 0x394   : > { %v1499_v53 = vpop.f32.mrb[9].mxu1  ;;  %v939_v54 = vsel %vm540_vm2, %v933_v52, -inf }
 0x395   : > { %940 = vmax.xlane.f32.xlu0 %v939_v54  ;;  %v936_v55 = vpop.f32.mrb[10].mxu1 }
 0x396   : > { %v1500_v56 = vpop.f32.mrb[11].mxu1 }
 0x3ab   : > { %712 = vrot.lane.b32.xlu0 %v1872_v25, %s1710_s16  ;;  %s1714_s16 = smov 16  }
 0x3b6   : > { %821 = vmax.xlane.f32.xlu1 %v820_v57 }
 0x3c7   : > { %831 = vrot.lane.b32.xlu1 %v1872_v25, %s1711_s20  ;;  %s1715_s20 = smov 24  }
 0x3cb   : > { %950 = vrot.lane.b32.xlu1 %v1872_v25, %s1712_s21  ;;  %s1411_s21 = sshll.u32 %s1808_s29, 7  ;;  %s1295_s29 = scalar_lea.sflag [#allocation4], %s429_s30 }
 0x3cc   : > { %s2012_s1 = scalar_lea.hbm %s2068_s13, %s1411_s21 }
 0x40e   : > { %v589_v58 = vpop.xlane.xlu1 %588 }
 0x40f   : > { %v590_v59 = vsub.f32 %v581_v38, %v589_v58 }
 0x411   : > { %v591_v60 = vmul.f32 1.442695, %v590_v59 }
 0x412   : > { %v703_v61 = vpop.xlane.xlu0 %702  ;;  %v599_v62 = vpop.permute.xlu1 %598 }
 0x413   : > { %1614 = vpow2.f32 %v591_v60  ;;  %v704_v63 = vsub.f32 %v695_v43, %v703_v61  ;;  %v605_v1 = vsel %vm603_vm3, %v599_v62, 0 }
 0x414   : > { %1466 = vmatpush3.bf16.msra.mxu0 %v605_v1 }
 0x415   : > { %v705_v2 = vmul.f32 1.442695, %v704_v63  ;;  %1477 = vmatprep.subr.bf16.mxu0 %v1700_v8 }
 0x417   : > { %1616 = vpow2.f32 %v705_v2 }
 0x41d   : > { %v1615_v3 = vpop.eup %1614 }
 0x41e   : > { %v597_v4 = vpack.c.bf16 %v1615_v3, %v1615_v3  ;;  %v593_v16 = vsel %vm540_vm2, %v1615_v3, 0.0  ;;  %v1390_v3 = vld [vmem:[%s2061_s6] ss:$0 sm:$0xff] }
 0x420   : > { %1468 = vmatmul.mubr.msk.bf16.vlgmr.msra.gmra.mrb[8].mxu0 %vm540_vm2, %v597_v4 }
 0x421   : > { %v1617_v5 = vpop.eup %1616  ;;  %1479 = vmatprep.mubr.msk.bf16.mxu0 %vm1701_vm1, %v1700_v8 }
 0x422   : > { %v941_v6 = vpop.xlane.xlu0 %940  ;;  %v707_v7 = vsel %vm540_vm2, %v1617_v5, 0.0  ;;  %v711_v13 = vpack.c.bf16 %v1617_v5, %v1617_v5 }
 0x423   : > { %v942_v9 = vsub.f32 %v933_v52, %v941_v6  ;;  %708 = vadd.xlane.f32.xlu0 %v707_v7  ;;  %v1601_v52 = vld [vmem:[%s2060_s5 + $0x8] sm:$0xff]  }
 0x425   : > { %v943_v10 = vmul.f32 1.442695, %v942_v9 }
 0x426   : > { %v713_v11 = vpop.permute.xlu0 %712 }
 0x427   : > { %1618 = vpow2.f32 %v943_v10  ;;  %v718_v12 = vsel %vm603_vm3, %v713_v11, 0 }
 0x428   : > { %1478 = vmatpush3.bf16.msra.mxu0 %v718_v12 }
 0x429   : > { %1489 = vmatprep.subr.bf16.mxu0 %v1700_v8 }
 0x42b   : > { %1480 = vmatmul.mubr.msk.bf16.vlgmr.msra.gmra.mrb[12].mxu0 %vm540_vm2, %v711_v13 }
 0x42c   : > { %1491 = vmatprep.mubr.msk.bf16.mxu0 %vm1701_vm1, %v1700_v8 }
 0x431   : > { %v1619_v14 = vpop.eup %1618 }
 0x432   : > { %v945_v15 = vsel %vm540_vm2, %v1619_v14, 0.0  ;;  %v949_v27 = vpack.c.bf16 %v1619_v14, %v1619_v14 }
 0x433   : > { %946 = vadd.xlane.f32.xlu0 %v945_v15 }
 0x437   : > { %594 = vadd.xlane.f32.xlu0 %v593_v16 }
 0x443   : > { %v822_v17 = vpop.xlane.xlu1 %821 }
 0x444   : > { %v823_v18 = vsub.f32 %v814_v48, %v822_v17  ;;  %v1600_v48 = vld [vmem:[%s2060_s5] sm:$0xff]  }
 0x445   : > { %1508 = vmatpush3.bf16.msra.mxu1 %v1600_v48  ;;  %v1602_v17 = vld [vmem:[%s2064_s9] sm:$0xff]  }
 0x446   : > { %v824_v19 = vmul.f32 1.442695, %v823_v18  ;;  %1509 = vmatprep.subr.bf16.mxu1 %v1700_v8  ;;  %v1401_v48 = vld [vmem:[%s2067_s12] ss:$0 sm:$0xff] }
 0x447   : > { %v832_v20 = vpop.permute.xlu1 %831 }
 0x448   : > { %1620 = vpow2.f32 %v824_v19  ;;  %v837_v21 = vsel %vm603_vm3, %v832_v20, 0 }
 0x449   : > { %1490 = vmatpush3.bf16.msra.mxu0 %v837_v21  ;;  %1510 = vmatpush3.bf16.msra.mxu1 %v1601_v52 }
 0x44a   : > { %1501 = vmatprep.subr.bf16.mxu0 %v1700_v8  ;;  %1523 = vmatprep.subr.bf16.mxu1 %v1700_v8 }
 0x44b   : > { %v951_v23 = vpop.permute.xlu1 %950 }
 0x44c   : > { %v956_v26 = vsel %vm603_vm3, %v951_v23, 0 }
 0x452   : > { %v1621_v22 = vpop.eup %1620 }
 0x453   : > { %v826_v24 = vsel %vm540_vm2, %v1621_v22, 0.0  ;;  %v830_v25 = vpack.c.bf16 %v1621_v22, %v1621_v22  ;;  %v1394_v22 = vld [vmem:[%s2062_s7] ss:$0 sm:$0xff] }
 0x454   : > { %827 = vadd.xlane.f32.xlu1 %v826_v24  ;;  %v1395_v24 = vld [vmem:[%s2063_s8] ss:$0 sm:$0xff] }
 0x455   : > { %1492 = vmatmul.mubr.msk.bf16.vlgmr.msra.gmra.mrb[16].mxu0 %vm540_vm2, %v830_v25 }
 0x456   : > { %1502 = vmatpush3.bf16.msra.mxu0 %v956_v26  ;;  %1503 = vmatprep.mubr.msk.bf16.mxu0 %vm1701_vm1, %v1700_v8 }
 0x457   : > { %1515 = vmatprep.subr.bf16.mxu0 %v1700_v8 }
 0x45d   : > { %1504 = vmatmul.mubr.msk.bf16.vlgmr.msra.gmra.mrb[20].mxu0 %vm540_vm2, %v949_v27 }
 0x45e   : > { %1519 = vmatprep.mubr.msk.bf16.mxu0 %vm1701_vm1, %v1700_v8  ;;  %1516 = vmatpush3.bf16.msra.mxu0 %v1602_v17 }
 0x45f   : > { %1517 = vmatprep.subr.bf16.mxu0 %v1700_v8 }
 0x4b0   : > { %v709_v28 = vpop.xlane.xlu0 %708 }
 0x4c0   : > { %v947_v29 = vpop.xlane.xlu0 %946 }
 0x4c4   : > { %v595_v30 = vpop.xlane.xlu0 %594 }
 0x4c5   : > { %1622 = vrcp.f32 %v595_v30  ;;  %v1606_v30 = vld [vmem:[%s2066_s11 + $0x10] sm:$0xff]  }
 0x4c6   : > { %1624 = vrcp.f32 %v709_v28  ;;  %v1604_v28 = vld [vmem:[%s2066_s11] sm:$0xff]  }
 0x4cf   : > { %v1623_v31 = vpop.eup %1622 }
 0x4d0   : > { %v1625_v38 = vpop.eup %1624 }
 0x4e1   : > { %v828_v45 = vpop.xlane.xlu1 %827 }
 0x4e2   : > { %1626 = vrcp.f32 %v828_v45 }
 0x4e3   : > { %1628 = vrcp.f32 %v947_v29  ;;  %v1605_v29 = vld [vmem:[%s2066_s11 + $0x8] sm:$0xff]  }
 0x4ec   : > { %v1627_v46 = vpop.eup %1626 }
 0x4ed   : > { %v1629_v55 = vpop.eup %1628 }
 0x4f3   : > { %v641_v32 = vpop.f32.mrb[8].mxu0 }
 0x4f4   : > { %v647_v33 = vmul.f32 %v1623_v31, %v641_v32  ;;  %v1469_v34 = vpop.f32.mrb[9].mxu0  ;;  %v1607_v31 = vld [vmem:[%s2066_s11 + $0x18] sm:$0xff]   ;;  %v1608_v32 = vld [vmem:[%s2066_s11 + $0x20] sm:$0xff]  }
 0x4f5   : > { %v644_v35 = vpop.f32.mrb[10].mxu0  ;;  %v1610_v34 = vld [vmem:[%s2066_s11 + $0x30] sm:$0xff]  }
 0x4f6   : > { %v648_v36 = vpack.c.bf16 %v647_v33, %v647_v33  ;;  %v1470_v37 = vpop.f32.mrb[11].mxu0  ;;  %v1609_v33 = vld [vmem:[%s2066_s11 + $0x28] sm:$0xff]   ;;  %v1611_v35 = vld [vmem:[%s2066_s11 + $0x38] sm:$0xff]  }
 0x4f8   : > { %650 = vst.msk [vmem:[#allocation2] sm:$0xf] %vm649_vm4, %v648_v36  ;;  %v1396_v36 = vld [vmem:[%s2065_s10] ss:$0 sm:$0xff] }
 0x4fe   : > { %v754_v39 = vpop.f32.mrb[12].mxu0 }
 0x4ff   : > { %v760_v40 = vmul.f32 %v1625_v38, %v754_v39  ;;  %v1481_v41 = vpop.f32.mrb[13].mxu0 }
 0x500   : > { %v757_v42 = vpop.f32.mrb[14].mxu0 }
 0x501   : > { %v1414_v43 = vpack.c.bf16 %v760_v40, %v760_v40  ;;  %v1482_v44 = vpop.f32.mrb[15].mxu0 }
 0x503   : > { %765 = vrot.lane.b32.xlu1 %v1414_v43, %s1713_s22  ;;  %s431_s22 = scalar_lea.vmem [#allocation3], %s1371_s15 }
 0x504   : > { %s1308_s23 = sshll.u32 %s431_s22, 4  ;;  %s2014_s23 = int_to_ptr.vmem [resolvable:$true] %s1308_s23 }
 0x505   : > { %s1636_s15 = scalar_lea.vmem %s2014_s23, 128 }
 0x506   : > { %p1637_p11 = scmp.ne.s32.totalorder %s2014_s23, %s1636_s15 }
 0x508   : > { %p1638_p12 = pnand %p1637_p11, %p1825_p5 }
 0x50a   : > { %p1639_p13 = pneg %p1638_p12 }
 0x528   : > { %v873_v47 = vpop.f32.mrb[16].mxu0 }
 0x529   : > { %v879_v49 = vmul.f32 %v1627_v46, %v873_v47  ;;  %v1493_v50 = vpop.f32.mrb[17].mxu0 }
 0x52a   : > { %v876_v51 = vpop.f32.mrb[18].mxu0 }
 0x52b   : > { %v1415_v53 = vpack.c.bf16 %v879_v49, %v879_v49  ;;  %v1494_v54 = vpop.f32.mrb[19].mxu0 }
 0x52d   : > { %884 = vrot.lane.b32.xlu0 %v1415_v53, %s1714_s16  ;;  %s1716_s16 = smov [#allocation3]  }
 0x530   : > { %v992_v56 = vpop.f32.mrb[20].mxu0 }
 0x531   : > { %v998_v57 = vmul.f32 %v1629_v55, %v992_v56  ;;  %v1505_v58 = vpop.f32.mrb[21].mxu0 }
 0x532   : > { %v995_v59 = vpop.f32.mrb[22].mxu0 }
 0x533   : > { %v1416_v60 = vpack.c.bf16 %v998_v57, %v998_v57  ;;  %v1506_v61 = vpop.f32.mrb[23].mxu0 }
 0x535   : > { %1003 = vrot.lane.b32.xlu1 %v1416_v60, %s1715_s20  ;;  %s1640_s20 = sshll.u32 %s1716_s16, 4  ;;  %s1641_s20 = int_to_ptr.vmem [resolvable:$false] %s1640_s20 }
 0x536   : > { %s1642_s2 = scalar_lea.vmem %s1641_s20, 256  ;;  %p1643_p0 = scmp.lt.s32.totalorder %s2014_s23, %s1641_s20 }
 0x537   : > { %p1644_p1 = scmp.lt.s32.totalorder %s1642_s2, %s1636_s15 }
 0x539   : > { %p1645_p2 = por %p1644_p1, %p1643_p0 }
 0x53b   : > { %p1646_p3 = pnand %p1645_p2, %p1639_p13 }
 0x575   : > { %v766_v62 = vpop.permute.xlu1 %765 }
 0x576   : > { %769 = vst.msk [vmem:[#allocation2] sm:$0xf] %vm768_vm5, %v766_v62 }
 0x59f   : > { %v885_v63 = vpop.permute.xlu0 %884 }
 0x5a0   : > { %888 = vst.msk [vmem:[#allocation2] sm:$0xf] %vm887_vm6, %v885_v63 }
 0x5a7   : > { %v1004_v1 = vpop.permute.xlu1 %1003 }
 0x5a8   : > { %1007 = vst.msk [vmem:[#allocation2] sm:$0xf] %vm1006_vm7, %v1004_v1 }
 0x5af   : > { %v1008_v2 = vld [vmem:[#allocation2] sm:$0xf] }
 0x5b0   : > { %1512 = vmatmul.mubr.msk.bf16.vlgmr.msra.gmra.mrb[12].mxu1 %vm440_vm0, %v1008_v2 }
 0x5b1   : > { %1539 = vmatprep.mubr.msk.bf16.mxu1 %vm1701_vm1, %v1700_v8  ;;  %1524 = vmatpush3.bf16.msra.mxu1 %v1604_v28 }
 0x5b2   : > { %1525 = vmatprep.subr.bf16.mxu1 %v1700_v8 }
 0x5b5   : > { %1526 = vmatpush3.bf16.msra.mxu1 %v1605_v29 }
 0x5b6   : > { %1527 = vmatprep.subr.bf16.mxu1 %v1700_v8 }
 0x5b9   : > { %1528 = vmatpush3.bf16.msra.mxu1 %v1606_v30 }
 0x5ba   : > { %1529 = vmatprep.subr.bf16.mxu1 %v1700_v8 }
 0x5bd   : > { %1530 = vmatpush3.bf16.msra.mxu1 %v1607_v31 }
 0x5be   : > { %1531 = vmatprep.subr.bf16.mxu1 %v1700_v8 }
 0x5c1   : > { %1532 = vmatpush3.bf16.msra.mxu1 %v1608_v32 }
 0x5c2   : > { %1533 = vmatprep.subr.bf16.mxu1 %v1700_v8 }
 0x5c5   : > { %1534 = vmatpush3.bf16.msra.mxu1 %v1609_v33 }
 0x5c6   : > { %1535 = vmatprep.subr.bf16.mxu1 %v1700_v8 }
 0x5c9   : > { %1536 = vmatpush3.bf16.msra.mxu1 %v1610_v34 }
 0x5ca   : > { %1537 = vmatprep.subr.bf16.mxu1 %v1700_v8 }
 0x5cd   : > { %1538 = vmatpush3.bf16.msra.mxu1 %v1611_v35 }
 0x683   : > { %v1069_v4 = vpop.f32.mrb[12].mxu1 }
 0x684   : > { %v1070_v5 = vadd.f32 %v1390_v3, %v1069_v4  ;;  %v1513_v6 = vpop.f32.mrb[13].mxu1 }
 0x685   : > { %v1072_v7 = vpop.f32.mrb[14].mxu1 }
 0x686   : > { %v1949_v9 = vadd.f32 %v1070_v5, %v1840_v0  ;;  %v1514_v10 = vpop.f32.mrb[15].mxu1  ;;  %v1603_v0 = vld [vmem:[%s2064_s9 + $0x8] sm:$0xff]  }
 0x687   : > { %1518 = vmatpush3.bf16.msra.mxu0 %v1603_v0 }
 0x688   : > { %v1078_v11 = vsel %vm440_vm0, %v1949_v9, 0.0 }
 0x689   : > { %1079 = vadd.xlane.f32.xlu1 %v1078_v11 }
 0x716   : > { %v1080_v12 = vpop.xlane.xlu1 %1079 }
 0x717   : > { %v1081_v13 = vmul.f32 0.03125, %v1080_v12 }
 0x719   : > { %v1082_v14 = vsub.f32 %v1949_v9, %v1081_v13 }
 0x71b   : > { %v1083_v15 = vmul.f32 %v1082_v14, %v1082_v14 }
 0x71d   : > { %v1084_v16 = vsel %vm440_vm0, %v1083_v15, 0.0 }
 0x71e   : > { %1085 = vadd.xlane.f32.xlu0 %v1084_v16 }
 0x7ab   : > { %v1086_v18 = vpop.xlane.xlu0 %1085 }
 0x7ac   : > { %v1087_v19 = vmul.f32 0.03125, %v1086_v18 }
 0x7ae   : > { %v1088_v20 = vadd.f32 1e-05, %v1087_v19 }
 0x7b0   : > { %1630 = vrsqrt.f32 %v1088_v20 }
 0x7ba   : > { %v1631_v21 = vpop.eup %1630 }
 0x7bb   : > { %v1090_v23 = vmul.f32 %v1631_v21, %v1082_v14 }
 0x7bd   : > { %v1097_v25 = vmul.f32 %v1394_v22, %v1090_v23 }
 0x7bf   : > { %v1104_v26 = vadd.f32 %v1395_v24, %v1097_v25 }
 0x7c1   : > { %v1105_v27 = vpack.c.bf16 %v1104_v26, %v1104_v26 }
 0x7c3   : > { %1520 = vmatmul.mubr.msk.bf16.vlgmr.msra.gmra.mrb[24].mxu0 %vm440_vm0, %v1105_v27 }
 0x896   : > { %v1166_v37 = vpop.f32.mrb[24].mxu0 }
 0x897   : > { %v1167_v38 = vadd.f32 %v1396_v36, %v1166_v37  ;;  %v1521_v39 = vpop.f32.mrb[25].mxu0 }
 0x898   : > { %v1169_v40 = vpop.f32.mrb[26].mxu0 }
 0x899   : > { %v1400_v41 = vmul.f32 -1.702, %v1167_v38  ;;  %v1522_v42 = vpop.f32.mrb[27].mxu0 }
 0x89b   : > { %v1174_v43 = vmul.f32 1.442695, %v1400_v41 }
 0x89d   : > { %1632 = vpow2.f32 %v1174_v43 }
 0x8a7   : > { %v1633_v8 = vpop.eup %1632 }
 0x8a8   : > { %v1176_v44 = vadd.f32 1.0, %v1633_v8 }
 0x8aa   : > { %1634 = vrcp.f32 %v1176_v44 }
 0x8b4   : > { %v1635_v45 = vpop.eup %1634 }
 0x8b5   : > { %v1179_v46 = vmul.f32 %v1635_v45, %v1167_v38 }
 0x8b7   : > { %v1180_v47 = vpack.c.bf16 %v1179_v46, %v1179_v46 }
 0x8b9   : > { %1540 = vmatmul.mubr.bf16.vlgmr.msra.gmra.mrb[16].mxu1 %v1180_v47 }
 0x98c   : > { %v1286_v49 = vpop.f32.mrb[16].mxu1 }
 0x98d   : > { %v1287_v50 = vadd.f32 %v1401_v48, %v1286_v49  ;;  %v1541_v51 = vpop.f32.mrb[17].mxu1 }
 0x98e   : > { %v1289_v52 = vpop.f32.mrb[18].mxu1 }
 0x98f   : > { %v1292_v53 = vadd.f32 %v1287_v50, %v1949_v9  ;;  %v1542_v54 = vpop.f32.mrb[19].mxu1 }
 0x991   : > { %1293 = vst.msk [vmem:[%s431_s22] sm:$0xff] %vm440_vm0, %v1292_v53 }
 0x992   : > { %1649 = shalt.err (!%p1646_p3)
}
 0x993   : > { %s1650_s0 = scalar_lea.hbm %s2012_s1, 128  ;;  %s1654_s22 = scalar_lea.hbm %s2068_s13, 256 }
 0x994   : > { %p1651_p4 = scmp.ne.s32.totalorder %s2012_s1, %s1650_s0  ;;  %p1655_p9 = scmp.lt.u32.totalorder %s2012_s1, %s2068_s13 }
 0x995   : > { %p1656_p10 = scmp.lt.u32.totalorder %s1654_s22, %s1650_s0  ;;  %p1658_p12 = scmp.lt.u32.totalorder %s1650_s0, %s2012_s1 }
 0x996   : > { %p1652_p7 = pnand %p1651_p4, %p1825_p5 }
 0x997   : > { %p1657_p11 = por %p1656_p10, %p1655_p9 }
 0x998   : > { %p1653_p8 = pneg %p1652_p7 }
 0x999   : > { %p1659_p13 = por %p1658_p12, %p1657_p11 }
 0x99b   : > { %p1660_p0 = pnand %p1659_p13, %p1653_p8 }
 0x99d   : > { %1663 = shalt.err (!%p1660_p0)
}
 0x99e   : > { %1543 = dma.vmem_to_hbm [thread:$0]  (%p1825_p5), %s2014_s23, 128, %s2012_s1, %s1295_s29  }
 0x99f PF: > { %p1549_p1 = scmp.ge.s32.totalorder %s1698_s28, 2  ;;  %s1320_s2 = sand.u32 1, %s1686_s25  }
 0x9a0   : > { %s1321_s15 = scalar_lea.sflag [#allocation4], %s1320_s2 }
 0x9a1   : > { %p1546_p2 = pnand %p1549_p1, %p1829_p6 }
 0x9a3   : > { %1681 = dma.done.wait (!%p1546_p2), %s1321_s15, 128  }
 0x9a4   : > { %1683 = vsyncadd (!%p1546_p2), %s1321_s15, 4294967168  ;;  %p23_p3 = scmp.ge.s32.totalorder %s1812_s14, 4   ;;  %s2077_s25 = smov %s1690_s26 }
 0x9a5   : > { %s2078_s26 = smov %s1694_s27  ;;  %s2079_s27 = smov %s1823_s17 }
 0x9a6   : > { %s2080_s28 = smov %s1812_s14  ;;  %25 = sbr.rel (!%p23_p3) target bundleno = 7 (0x7), region = 107 }
 0x9ad   :  { %1326 = vsyncpa [#allocation4], 1 }
 0x9ae   :  { %1328 = vsyncpa [#allocation4 + $0x1], 1 }

</bundles_post_ra>
